<compile_context>
chip_gen: v7x
topology: tpu7x:2x2x1
jax: 0.10.0
libtpu: 0.0.40
codegen_flags: <defaults>
</compile_context>

<pallas_src>
import jax
import jax.numpy as jnp
from jax.experimental import pallas as pl
from jax.experimental.pallas import tpu as pltpu


# ----------------------------- Pallas kernel --------------------------------

def model_ias_kernel(emb_ref, mask_ref,
                     w_ih_cat_ref, b_cat_ref,
                     w_hh_f_ref, w_hh_b_ref,
                     w_slot_f_ref, w_slot_b_ref, b_slot_ref,
                     w_int_f_ref, w_int_b_ref, b_int_ref,
                     slots_ref, intent_ref,
                     enc_f_ref, enc_b_ref):
    """Bidirectional LSTM over padded sequences + linear heads.

    emb_ref    : [T*Bp, E] f32   time-major flattened embedded utterance
    mask_ref   : [T*Bp, H] f32   1.0 where t < len[b] else 0.0 (precomputed)
    w_ih_cat   : [E, 8H]         fwd gates in cols 0:4H, bwd in 4H:8H (i|f|o|g)
    b_cat      : [1, 8H]         combined (b_ih + b_hh) biases, fwd|bwd
    w_hh_f/b   : [H, 4H]         per-direction recurrent weights (i|f|o|g)
    w_slot_f/b : [H, S], b_slot: [1, S]
    w_int_f/b  : [H, I], b_int : [1, I]
    slots_ref  : [T*Bp, S] out   (row t*Bp + b)
    intent_ref : [Bp, I]   out
    enc_f/b_ref: [T*Bp, H] VMEM scratch (padded positions zeroed)
    """
    TB = emb_ref.shape[0]
    Bp = intent_ref.shape[0]
    T = TB // Bp
    H = w_hh_f_ref.shape[0]
    H4 = 4 * H

    # ---- hoisted input projection for both directions: one big MXU matmul ---
    xproj = (jnp.dot(emb_ref[...], w_ih_cat_ref[...],
                     preferred_element_type=jnp.float32)
             + b_cat_ref[...])                               # [T*Bp, 8H]

    w_hh_f = w_hh_f_ref[...]
    w_hh_b = w_hh_b_ref[...]
    mask = mask_ref[...]                                     # [T*Bp, H] f32
    imask = 1.0 - mask                                       # hoisted once

    def cell(xg, h, c, w_hh):
        gates = xg + jnp.dot(h, w_hh, preferred_element_type=jnp.float32)
        sig = jax.nn.sigmoid(gates[:, :3 * H])               # i|f|o in one EUP op
        g_g = jnp.tanh(gates[:, 3 * H:])                     # g in one EUP op
        i_g = sig[:, 0 * H:1 * H]
        f_g = sig[:, 1 * H:2 * H]
        o_g = sig[:, 2 * H:3 * H]
        c_new = f_g * c + i_g * g_g
        h_new = o_g * jnp.tanh(c_new)
        return h_new, c_new

    zeros_bh = jnp.zeros((Bp, H), jnp.float32)
    h_f, c_f = zeros_bh, zeros_bh
    h_b, c_b = zeros_bh, zeros_bh

    # ---- fused fwd/bwd recurrence, fully unrolled (T static & small) --------
    # packed-sequence semantics: state freezes once t >= len (so the backward
    # direction effectively starts at each sequence's len-1); padded encoder
    # positions are written as zero. All slices are static and 8-sublane /
    # 128-lane aligned because Bp % 8 == 0 and 4H == 128.
    for s in range(T):
        tf = s
        tb = T - 1 - s

        # forward direction @ time tf
        m_f = mask[tf * Bp:(tf + 1) * Bp, :]
        im_f = imask[tf * Bp:(tf + 1) * Bp, :]
        hf_new, cf_new = cell(xproj[tf * Bp:(tf + 1) * Bp, 0:H4],
                              h_f, c_f, w_hh_f)
        h_f = m_f * hf_new + im_f * h_f                      # exact {0,1} select
        c_f = m_f * cf_new + im_f * c_f
        enc_f_ref[tf * Bp:(tf + 1) * Bp, :] = m_f * hf_new

        # backward direction @ time tb
        m_b = mask[tb * Bp:(tb + 1) * Bp, :]
        im_b = imask[tb * Bp:(tb + 1) * Bp, :]
        hb_new, cb_new = cell(xproj[tb * Bp:(tb + 1) * Bp, H4:2 * H4],
                              h_b, c_b, w_hh_b)
        h_b = m_b * hb_new + im_b * h_b
        c_b = m_b * cb_new + im_b * c_b
        enc_b_ref[tb * Bp:(tb + 1) * Bp, :] = m_b * hb_new

    # ---- slot head: split weights, no concat --------------------------------
    slots_ref[...] = (
        jnp.dot(enc_f_ref[...], w_slot_f_ref[...],
                preferred_element_type=jnp.float32)
        + jnp.dot(enc_b_ref[...], w_slot_b_ref[...],
                  preferred_element_type=jnp.float32)
        + b_slot_ref[...])                                   # [T*Bp, S]

    # ---- intent head: split weights, no concat -------------------------------
    intent_ref[...] = (
        jnp.dot(h_f, w_int_f_ref[...], preferred_element_type=jnp.float32)
        + jnp.dot(h_b, w_int_b_ref[...], preferred_element_type=jnp.float32)
        + b_int_ref[...])                                    # [Bp, I]


# ----------------------------- wrapper ---------------------------------------

def model_ias_forward(params, utterance, seq_lengths):
    """utterance: [B, T] int32 token ids; seq_lengths: [B] int32.

    Returns (slots [B, out_slot, T], intent [B, out_int]) — matching the
    PyTorch module's forward (slots.permute(0, 2, 1)).
    """
    B, T = utterance.shape
    H = params['w_hh_f'].shape[0]
    S = params['w_slot'].shape[1]
    I = params['w_int'].shape[1]
    Bp = ((B + 7) // 8) * 8                                  # sublane-pad batch

    # glue: embedding gather (padding_idx row is zero in the table)
    emb = params['embedding'][utterance]                     # [B, T, E] f32
    E = emb.shape[-1]
    emb_tm = jnp.transpose(emb, (1, 0, 2))                   # [T, B, E] time-major
    emb_tm = jnp.pad(emb_tm, ((0, 0), (0, Bp - B), (0, 0)))  # pad batch rows
    emb2d = emb_tm.reshape(T * Bp, E)

    # glue: precomputed validity mask (padded batch rows get length 0)
    lens = seq_lengths.astype(jnp.int32)
    lens_p = jnp.pad(lens, (0, Bp - B))
    valid = (jnp.arange(T)[:, None] < lens_p[None, :]).astype(jnp.float32)  # [T, Bp]
    mask2d = jnp.broadcast_to(valid[:, :, None], (T, Bp, H)).reshape(T * Bp, H)

    # glue: reorder gate columns i|f|g|o -> i|f|o|g (sigmoid gates contiguous),
    # fuse fwd|bwd input projections to 8H, split head weights per direction.
    def reorder(w):
        return jnp.concatenate(
            [w[..., :2 * H], w[..., 3 * H:4 * H], w[..., 2 * H:3 * H]], axis=-1)

    w_ih_cat = jnp.concatenate([reorder(params['w_ih_f']),
                                reorder(params['w_ih_b'])], axis=1)     # [E, 8H]
    b_cat = jnp.concatenate([reorder(params['b_f']),
                             reorder(params['b_b'])], axis=1)           # [1, 8H]
    w_hh_f = reorder(params['w_hh_f'])
    w_hh_b = reorder(params['w_hh_b'])
    w_slot_f, w_slot_b = params['w_slot'][:H], params['w_slot'][H:]
    w_int_f, w_int_b = params['w_int'][:H], params['w_int'][H:]

    vmem = pl.BlockSpec(memory_space=pltpu.MemorySpace.VMEM)
    slots2d, intent_p = pl.pallas_call(
        model_ias_kernel,
        out_shape=(jax.ShapeDtypeStruct((T * Bp, S), jnp.float32),
                   jax.ShapeDtypeStruct((Bp, I), jnp.float32)),
        in_specs=[vmem] * 12,
        out_specs=(vmem, vmem),
        scratch_shapes=[pltpu.VMEM((T * Bp, H), jnp.float32),
                        pltpu.VMEM((T * Bp, H), jnp.float32)],
        compiler_params=pltpu.CompilerParams(
            vmem_limit_bytes=32 * 1024 * 1024),
    )(emb2d, mask2d,
      w_ih_cat, b_cat,
      w_hh_f, w_hh_b,
      w_slot_f, w_slot_b, params['b_slot'],
      w_int_f, w_int_b, params['b_int'])

    # glue: [T*Bp, S] -> [T, Bp, S] -> drop batch pad -> [B, S, T]
    slots = jnp.transpose(slots2d.reshape(T, Bp, S)[:, :B, :], (1, 2, 0))
    intent = intent_p[:B]
    return slots, intent


model_ias_forward_jit = jax.jit(model_ias_forward)


# ----------------------------- reference (pure JAX) ---------------------------

def model_ias_reference(params, utterance, seq_lengths):
    B, T = utterance.shape
    H = params['w_hh_f'].shape[0]
    emb = params['embedding'][utterance]                     # [B, T, E]
    lens = seq_lengths.astype(jnp.int32)

    def run_dir(w_ih, w_hh, b, reverse):
        h = jnp.zeros((B, H), jnp.float32)
        c = jnp.zeros((B, H), jnp.float32)
        outs = jnp.zeros((T, B, H), jnp.float32)
        ts = range(T - 1, -1, -1) if reverse else range(T)
        for t in ts:
            x_t = emb[:, t, :]
            gates = x_t @ w_ih + h @ w_hh + b
            i_g = jax.nn.sigmoid(gates[:, 0 * H:1 * H])
            f_g = jax.nn.sigmoid(gates[:, 1 * H:2 * H])
            g_g = jnp.tanh(gates[:, 2 * H:3 * H])
            o_g = jax.nn.sigmoid(gates[:, 3 * H:4 * H])
            c_new = f_g * c + i_g * g_g
            h_new = o_g * jnp.tanh(c_new)
            mask = (t < lens)[:, None]
            h = jnp.where(mask, h_new, h)
            c = jnp.where(mask, c_new, c)
            outs = outs.at[t].set(jnp.where(mask, h_new, 0.0))
        return outs, h

    out_f, h_f = run_dir(params['w_ih_f'], params['w_hh_f'], params['b_f'], False)
    out_b, h_b = run_dir(params['w_ih_b'], params['w_hh_b'], params['b_b'], True)
    enc = jnp.concatenate([out_f, out_b], axis=-1)           # [T, B, 2H]
    slots = jnp.einsum('tbk,ks->tbs', enc, params['w_slot']) + params['b_slot']
    intent = jnp.concatenate([h_f, h_b], axis=1) @ params['w_int'] + params['b_int']
    return jnp.transpose(slots, (1, 2, 0)), intent


# ----------------------------- main -------------------------------------------

if __name__ == "__main__":
    # small shapes consistent with the module
    vocab_len, emb_size, hid_size = 50, 32, 32
    out_slot, out_int = 10, 5
    B, T = 2, 8
    pad_index = 0

    key = jax.random.PRNGKey(0)
    ks = jax.random.split(key, 12)

    def init(k, shape, scale=0.1):
        return (scale * jax.random.normal(k, shape)).astype(jnp.float32)

    embedding = init(ks[0], (vocab_len, emb_size))
    embedding = embedding.at[pad_index].set(0.0)             # padding_idx row = 0

    params = dict(
        embedding=embedding,
        # forward-direction LSTM (weights stored transposed: [in, 4H], gates i|f|g|o)
        w_ih_f=init(ks[1], (emb_size, 4 * hid_size)),
        w_hh_f=init(ks[2], (hid_size, 4 * hid_size)),
        b_f=init(ks[3], (1, 4 * hid_size)),                  # b_ih + b_hh combined
        # backward-direction LSTM
        w_ih_b=init(ks[4], (emb_size, 4 * hid_size)),
        w_hh_b=init(ks[5], (hid_size, 4 * hid_size)),
        b_b=init(ks[6], (1, 4 * hid_size)),
        # heads (Linear weight stored as [in, out])
        w_slot=init(ks[7], (2 * hid_size, out_slot)),
        b_slot=init(ks[8], (1, out_slot)),
        w_int=init(ks[9], (2 * hid_size, out_int)),
        b_int=init(ks[10], (1, out_int)),
    )

    # deterministic inputs; lengths sorted descending (pack_padded_sequence default)
    utterance = jax.random.randint(ks[11], (B, T), 1, vocab_len, dtype=jnp.int32)
    seq_lengths = jnp.array([T, 5], dtype=jnp.int32)
    # zero out padded tokens (like a real padded batch)
    pos = jnp.arange(T)[None, :]
    utterance = jnp.where(pos < seq_lengths[:, None], utterance, pad_index)

    slots, intent = jax.block_until_ready(
        model_ias_forward_jit(params, utterance, seq_lengths))

    slots_ref, intent_ref = model_ias_reference(params, utterance, seq_lengths)
    assert slots.shape == (B, out_slot, T)
    assert intent.shape == (B, out_int)
    assert jnp.allclose(slots, slots_ref, atol=2e-3, rtol=2e-3)
    assert jnp.allclose(intent, intent_ref, atol=2e-3, rtol=2e-3)

    # TODO(synk): nn.Dropout is inactive (dropout=0 / eval mode), so it is not
    # implemented in the kernel.
    print("KERNEL_OK")
</pallas_src>

<mosaic_0001>
module attributes {stable_mosaic.version = 11 : i64} {
  func.func @model_ias_kernel(%arg0: memref<64x32xf32, #tpu.memory_space<vmem>>, %arg1: memref<64x32xf32, #tpu.memory_space<vmem>>, %arg2: memref<32x256xf32, #tpu.memory_space<vmem>>, %arg3: memref<1x256xf32, #tpu.memory_space<vmem>>, %arg4: memref<32x128xf32, #tpu.memory_space<vmem>>, %arg5: memref<32x128xf32, #tpu.memory_space<vmem>>, %arg6: memref<32x10xf32, #tpu.memory_space<vmem>>, %arg7: memref<32x10xf32, #tpu.memory_space<vmem>>, %arg8: memref<1x10xf32, #tpu.memory_space<vmem>>, %arg9: memref<32x5xf32, #tpu.memory_space<vmem>>, %arg10: memref<32x5xf32, #tpu.memory_space<vmem>>, %arg11: memref<1x5xf32, #tpu.memory_space<vmem>>, %arg12: memref<64x10xf32, #tpu.memory_space<vmem>>, %arg13: memref<8x5xf32, #tpu.memory_space<vmem>>, %arg14: memref<64x32xf32, #tpu.memory_space<vmem>>, %arg15: memref<64x32xf32, #tpu.memory_space<vmem>>) attributes {dimension_semantics = [], scalar_prefetch = 0 : i64, scratch_operands = 2 : i64, tpu.core_type = #tpu.core_type<tc>} {
    %c0 = arith.constant 0 : index
    %c0_0 = arith.constant 0 : index
    %0 = vector.load %arg0[%c0, %c0_0] : memref<64x32xf32, #tpu.memory_space<vmem>>, vector<64x32xf32>
    %c0_1 = arith.constant 0 : index
    %c0_2 = arith.constant 0 : index
    %1 = vector.load %arg2[%c0_1, %c0_2] : memref<32x256xf32, #tpu.memory_space<vmem>>, vector<32x256xf32>
    %cst = arith.constant dense<0.000000e+00> : vector<64x256xf32>
    %2 = tpu.matmul %0, %1, %cst {dimension_numbers = #tpu.dot_dimension_numbers<[1], [0], [0], [1], [0, 0, 1, 1], [], []>} : vector<64x32xf32>, vector<32x256xf32>, vector<64x256xf32> -> vector<64x256xf32>
    %c0_3 = arith.constant 0 : index
    %c0_4 = arith.constant 0 : index
    %3 = vector.load %arg3[%c0_3, %c0_4] : memref<1x256xf32, #tpu.memory_space<vmem>>, vector<1x256xf32>
    %4 = vector.broadcast %3 : vector<1x256xf32> to vector<64x256xf32>
    %5 = arith.addf %2, %4 : vector<64x256xf32>
    %c0_5 = arith.constant 0 : index
    %c0_6 = arith.constant 0 : index
    %6 = vector.load %arg4[%c0_5, %c0_6] : memref<32x128xf32, #tpu.memory_space<vmem>>, vector<32x128xf32>
    %c0_7 = arith.constant 0 : index
    %c0_8 = arith.constant 0 : index
    %7 = vector.load %arg5[%c0_7, %c0_8] : memref<32x128xf32, #tpu.memory_space<vmem>>, vector<32x128xf32>
    %c0_9 = arith.constant 0 : index
    %c0_10 = arith.constant 0 : index
    %8 = vector.load %arg1[%c0_9, %c0_10] : memref<64x32xf32, #tpu.memory_space<vmem>>, vector<64x32xf32>
    %cst_11 = arith.constant 1.000000e+00 : f32
    %9 = vector.broadcast %cst_11 : f32 to vector<64x32xf32>
    %10 = arith.subf %9, %8 : vector<64x32xf32>
    %cst_12 = arith.constant 0.000000e+00 : f32
    %11 = vector.broadcast %cst_12 : f32 to vector<8x32xf32>
    %12 = vector.extract_strided_slice %8 {offsets = [0, 0], sizes = [8, 32], strides = [1, 1]} : vector<64x32xf32> to vector<8x32xf32>
    %13 = vector.extract_strided_slice %10 {offsets = [0, 0], sizes = [8, 32], strides = [1, 1]} : vector<64x32xf32> to vector<8x32xf32>
    %14 = vector.extract_strided_slice %5 {offsets = [0, 0], sizes = [8, 128], strides = [1, 1]} : vector<64x256xf32> to vector<8x128xf32>
    %cst_13 = arith.constant dense<0.000000e+00> : vector<8x128xf32>
    %15 = tpu.matmul %11, %6, %cst_13 {dimension_numbers = #tpu.dot_dimension_numbers<[1], [0], [0], [1], [0, 0, 1, 1], [], []>} : vector<8x32xf32>, vector<32x128xf32>, vector<8x128xf32> -> vector<8x128xf32>
    %16 = arith.addf %14, %15 : vector<8x128xf32>
    %17 = vector.extract_strided_slice %16 {offsets = [0, 0], sizes = [8, 96], strides = [1, 1]} : vector<8x128xf32> to vector<8x96xf32>
    %18 = arith.negf %17 : vector<8x96xf32>
    %19 = math.exp %18 : vector<8x96xf32>
    %cst_14 = arith.constant 1.000000e+00 : f32
    %20 = vector.broadcast %cst_14 : f32 to vector<8x96xf32>
    %21 = arith.addf %20, %19 : vector<8x96xf32>
    %22 = arith.divf %20, %21 : vector<8x96xf32>
    %23 = vector.extract_strided_slice %16 {offsets = [0, 96], sizes = [8, 32], strides = [1, 1]} : vector<8x128xf32> to vector<8x32xf32>
    %24 = math.tanh %23 : vector<8x32xf32>
    %25 = vector.extract_strided_slice %22 {offsets = [0, 0], sizes = [8, 32], strides = [1, 1]} : vector<8x96xf32> to vector<8x32xf32>
    %26 = vector.extract_strided_slice %22 {offsets = [0, 32], sizes = [8, 32], strides = [1, 1]} : vector<8x96xf32> to vector<8x32xf32>
    %27 = vector.extract_strided_slice %22 {offsets = [0, 64], sizes = [8, 32], strides = [1, 1]} : vector<8x96xf32> to vector<8x32xf32>
    %28 = arith.mulf %26, %11 : vector<8x32xf32>
    %29 = arith.mulf %25, %24 : vector<8x32xf32>
    %30 = arith.addf %28, %29 : vector<8x32xf32>
    %31 = math.tanh %30 : vector<8x32xf32>
    %32 = arith.mulf %27, %31 : vector<8x32xf32>
    %33 = arith.mulf %12, %32 : vector<8x32xf32>
    %34 = arith.mulf %13, %11 : vector<8x32xf32>
    %35 = arith.addf %33, %34 : vector<8x32xf32>
    %36 = arith.mulf %12, %30 : vector<8x32xf32>
    %37 = arith.mulf %13, %11 : vector<8x32xf32>
    %38 = arith.addf %36, %37 : vector<8x32xf32>
    %39 = arith.mulf %12, %32 : vector<8x32xf32>
    %c0_15 = arith.constant 0 : index
    %c0_16 = arith.constant 0 : index
    %40 = vector.load %arg14[%c0_15, %c0_16] : memref<64x32xf32, #tpu.memory_space<vmem>>, vector<8x32xf32>
    tpu.vector_store %arg14[%c0_15, %c0_16], %39 {strides = array<i32>} : memref<64x32xf32, #tpu.memory_space<vmem>>, vector<8x32xf32>,
    %41 = vector.extract_strided_slice %8 {offsets = [56, 0], sizes = [8, 32], strides = [1, 1]} : vector<64x32xf32> to vector<8x32xf32>
    %42 = vector.extract_strided_slice %10 {offsets = [56, 0], sizes = [8, 32], strides = [1, 1]} : vector<64x32xf32> to vector<8x32xf32>
    %43 = vector.extract_strided_slice %5 {offsets = [56, 128], sizes = [8, 128], strides = [1, 1]} : vector<64x256xf32> to vector<8x128xf32>
    %cst_17 = arith.constant dense<0.000000e+00> : vector<8x128xf32>
    %44 = tpu.matmul %11, %7, %cst_17 {dimension_numbers = #tpu.dot_dimension_numbers<[1], [0], [0], [1], [0, 0, 1, 1], [], []>} : vector<8x32xf32>, vector<32x128xf32>, vector<8x128xf32> -> vector<8x128xf32>
    %45 = arith.addf %43, %44 : vector<8x128xf32>
    %46 = vector.extract_strided_slice %45 {offsets = [0, 0], sizes = [8, 96], strides = [1, 1]} : vector<8x128xf32> to vector<8x96xf32>
    %47 = arith.negf %46 : vector<8x96xf32>
    %48 = math.exp %47 : vector<8x96xf32>
    %cst_18 = arith.constant 1.000000e+00 : f32
    %49 = vector.broadcast %cst_18 : f32 to vector<8x96xf32>
    %50 = arith.addf %49, %48 : vector<8x96xf32>
    %51 = arith.divf %49, %50 : vector<8x96xf32>
    %52 = vector.extract_strided_slice %45 {offsets = [0, 96], sizes = [8, 32], strides = [1, 1]} : vector<8x128xf32> to vector<8x32xf32>
    %53 = math.tanh %52 : vector<8x32xf32>
    %54 = vector.extract_strided_slice %51 {offsets = [0, 0], sizes = [8, 32], strides = [1, 1]} : vector<8x96xf32> to vector<8x32xf32>
    %55 = vector.extract_strided_slice %51 {offsets = [0, 32], sizes = [8, 32], strides = [1, 1]} : vector<8x96xf32> to vector<8x32xf32>
    %56 = vector.extract_strided_slice %51 {offsets = [0, 64], sizes = [8, 32], strides = [1, 1]} : vector<8x96xf32> to vector<8x32xf32>
    %57 = arith.mulf %55, %11 : vector<8x32xf32>
    %58 = arith.mulf %54, %53 : vector<8x32xf32>
    %59 = arith.addf %57, %58 : vector<8x32xf32>
    %60 = math.tanh %59 : vector<8x32xf32>
    %61 = arith.mulf %56, %60 : vector<8x32xf32>
    %62 = arith.mulf %41, %61 : vector<8x32xf32>
    %63 = arith.mulf %42, %11 : vector<8x32xf32>
    %64 = arith.addf %62, %63 : vector<8x32xf32>
    %65 = arith.mulf %41, %59 : vector<8x32xf32>
    %66 = arith.mulf %42, %11 : vector<8x32xf32>
    %67 = arith.addf %65, %66 : vector<8x32xf32>
    %68 = arith.mulf %41, %61 : vector<8x32xf32>
    %c56 = arith.constant 56 : index
    %c0_19 = arith.constant 0 : index
    %69 = vector.load %arg15[%c56, %c0_19] : memref<64x32xf32, #tpu.memory_space<vmem>>, vector<8x32xf32>
    tpu.vector_store %arg15[%c56, %c0_19], %68 {strides = array<i32>} : memref<64x32xf32, #tpu.memory_space<vmem>>, vector<8x32xf32>,
    %70 = vector.extract_strided_slice %8 {offsets = [8, 0], sizes = [8, 32], strides = [1, 1]} : vector<64x32xf32> to vector<8x32xf32>
    %71 = vector.extract_strided_slice %10 {offsets = [8, 0], sizes = [8, 32], strides = [1, 1]} : vector<64x32xf32> to vector<8x32xf32>
    %72 = vector.extract_strided_slice %5 {offsets = [8, 0], sizes = [8, 128], strides = [1, 1]} : vector<64x256xf32> to vector<8x128xf32>
    %cst_20 = arith.constant dense<0.000000e+00> : vector<8x128xf32>
    %73 = tpu.matmul %35, %6, %cst_20 {dimension_numbers = #tpu.dot_dimension_numbers<[1], [0], [0], [1], [0, 0, 1, 1], [], []>} : vector<8x32xf32>, vector<32x128xf32>, vector<8x128xf32> -> vector<8x128xf32>
    %74 = arith.addf %72, %73 : vector<8x128xf32>
    %75 = vector.extract_strided_slice %74 {offsets = [0, 0], sizes = [8, 96], strides = [1, 1]} : vector<8x128xf32> to vector<8x96xf32>
    %76 = arith.negf %75 : vector<8x96xf32>
    %77 = math.exp %76 : vector<8x96xf32>
    %cst_21 = arith.constant 1.000000e+00 : f32
    %78 = vector.broadcast %cst_21 : f32 to vector<8x96xf32>
    %79 = arith.addf %78, %77 : vector<8x96xf32>
    %80 = arith.divf %78, %79 : vector<8x96xf32>
    %81 = vector.extract_strided_slice %74 {offsets = [0, 96], sizes = [8, 32], strides = [1, 1]} : vector<8x128xf32> to vector<8x32xf32>
    %82 = math.tanh %81 : vector<8x32xf32>
    %83 = vector.extract_strided_slice %80 {offsets = [0, 0], sizes = [8, 32], strides = [1, 1]} : vector<8x96xf32> to vector<8x32xf32>
    %84 = vector.extract_strided_slice %80 {offsets = [0, 32], sizes = [8, 32], strides = [1, 1]} : vector<8x96xf32> to vector<8x32xf32>
    %85 = vector.extract_strided_slice %80 {offsets = [0, 64], sizes = [8, 32], strides = [1, 1]} : vector<8x96xf32> to vector<8x32xf32>
    %86 = arith.mulf %84, %38 : vector<8x32xf32>
    %87 = arith.mulf %83, %82 : vector<8x32xf32>
    %88 = arith.addf %86, %87 : vector<8x32xf32>
    %89 = math.tanh %88 : vector<8x32xf32>
    %90 = arith.mulf %85, %89 : vector<8x32xf32>
    %91 = arith.mulf %70, %90 : vector<8x32xf32>
    %92 = arith.mulf %71, %35 : vector<8x32xf32>
    %93 = arith.addf %91, %92 : vector<8x32xf32>
    %94 = arith.mulf %70, %88 : vector<8x32xf32>
    %95 = arith.mulf %71, %38 : vector<8x32xf32>
    %96 = arith.addf %94, %95 : vector<8x32xf32>
    %97 = arith.mulf %70, %90 : vector<8x32xf32>
    %c8 = arith.constant 8 : index
    %c0_22 = arith.constant 0 : index
    %98 = vector.load %arg14[%c8, %c0_22] : memref<64x32xf32, #tpu.memory_space<vmem>>, vector<8x32xf32>
    tpu.vector_store %arg14[%c8, %c0_22], %97 {strides = array<i32>} : memref<64x32xf32, #tpu.memory_space<vmem>>, vector<8x32xf32>,
    %99 = vector.extract_strided_slice %8 {offsets = [48, 0], sizes = [8, 32], strides = [1, 1]} : vector<64x32xf32> to vector<8x32xf32>
    %100 = vector.extract_strided_slice %10 {offsets = [48, 0], sizes = [8, 32], strides = [1, 1]} : vector<64x32xf32> to vector<8x32xf32>
    %101 = vector.extract_strided_slice %5 {offsets = [48, 128], sizes = [8, 128], strides = [1, 1]} : vector<64x256xf32> to vector<8x128xf32>
    %cst_23 = arith.constant dense<0.000000e+00> : vector<8x128xf32>
    %102 = tpu.matmul %64, %7, %cst_23 {dimension_numbers = #tpu.dot_dimension_numbers<[1], [0], [0], [1], [0, 0, 1, 1], [], []>} : vector<8x32xf32>, vector<32x128xf32>, vector<8x128xf32> -> vector<8x128xf32>
    %103 = arith.addf %101, %102 : vector<8x128xf32>
    %104 = vector.extract_strided_slice %103 {offsets = [0, 0], sizes = [8, 96], strides = [1, 1]} : vector<8x128xf32> to vector<8x96xf32>
    %105 = arith.negf %104 : vector<8x96xf32>
    %106 = math.exp %105 : vector<8x96xf32>
    %cst_24 = arith.constant 1.000000e+00 : f32
    %107 = vector.broadcast %cst_24 : f32 to vector<8x96xf32>
    %108 = arith.addf %107, %106 : vector<8x96xf32>
    %109 = arith.divf %107, %108 : vector<8x96xf32>
    %110 = vector.extract_strided_slice %103 {offsets = [0, 96], sizes = [8, 32], strides = [1, 1]} : vector<8x128xf32> to vector<8x32xf32>
    %111 = math.tanh %110 : vector<8x32xf32>
    %112 = vector.extract_strided_slice %109 {offsets = [0, 0], sizes = [8, 32], strides = [1, 1]} : vector<8x96xf32> to vector<8x32xf32>
    %113 = vector.extract_strided_slice %109 {offsets = [0, 32], sizes = [8, 32], strides = [1, 1]} : vector<8x96xf32> to vector<8x32xf32>
    %114 = vector.extract_strided_slice %109 {offsets = [0, 64], sizes = [8, 32], strides = [1, 1]} : vector<8x96xf32> to vector<8x32xf32>
    %115 = arith.mulf %113, %67 : vector<8x32xf32>
    %116 = arith.mulf %112, %111 : vector<8x32xf32>
    %117 = arith.addf %115, %116 : vector<8x32xf32>
    %118 = math.tanh %117 : vector<8x32xf32>
    %119 = arith.mulf %114, %118 : vector<8x32xf32>
    %120 = arith.mulf %99, %119 : vector<8x32xf32>
    %121 = arith.mulf %100, %64 : vector<8x32xf32>
    %122 = arith.addf %120, %121 : vector<8x32xf32>
    %123 = arith.mulf %99, %117 : vector<8x32xf32>
    %124 = arith.mulf %100, %67 : vector<8x32xf32>
    %125 = arith.addf %123, %124 : vector<8x32xf32>
    %126 = arith.mulf %99, %119 : vector<8x32xf32>
    %c48 = arith.constant 48 : index
    %c0_25 = arith.constant 0 : index
    %127 = vector.load %arg15[%c48, %c0_25] : memref<64x32xf32, #tpu.memory_space<vmem>>, vector<8x32xf32>
    tpu.vector_store %arg15[%c48, %c0_25], %126 {strides = array<i32>} : memref<64x32xf32, #tpu.memory_space<vmem>>, vector<8x32xf32>,
    %128 = vector.extract_strided_slice %8 {offsets = [16, 0], sizes = [8, 32], strides = [1, 1]} : vector<64x32xf32> to vector<8x32xf32>
    %129 = vector.extract_strided_slice %10 {offsets = [16, 0], sizes = [8, 32], strides = [1, 1]} : vector<64x32xf32> to vector<8x32xf32>
    %130 = vector.extract_strided_slice %5 {offsets = [16, 0], sizes = [8, 128], strides = [1, 1]} : vector<64x256xf32> to vector<8x128xf32>
    %cst_26 = arith.constant dense<0.000000e+00> : vector<8x128xf32>
    %131 = tpu.matmul %93, %6, %cst_26 {dimension_numbers = #tpu.dot_dimension_numbers<[1], [0], [0], [1], [0, 0, 1, 1], [], []>} : vector<8x32xf32>, vector<32x128xf32>, vector<8x128xf32> -> vector<8x128xf32>
    %132 = arith.addf %130, %131 : vector<8x128xf32>
    %133 = vector.extract_strided_slice %132 {offsets = [0, 0], sizes = [8, 96], strides = [1, 1]} : vector<8x128xf32> to vector<8x96xf32>
    %134 = arith.negf %133 : vector<8x96xf32>
    %135 = math.exp %134 : vector<8x96xf32>
    %cst_27 = arith.constant 1.000000e+00 : f32
    %136 = vector.broadcast %cst_27 : f32 to vector<8x96xf32>
    %137 = arith.addf %136, %135 : vector<8x96xf32>
    %138 = arith.divf %136, %137 : vector<8x96xf32>
    %139 = vector.extract_strided_slice %132 {offsets = [0, 96], sizes = [8, 32], strides = [1, 1]} : vector<8x128xf32> to vector<8x32xf32>
    %140 = math.tanh %139 : vector<8x32xf32>
    %141 = vector.extract_strided_slice %138 {offsets = [0, 0], sizes = [8, 32], strides = [1, 1]} : vector<8x96xf32> to vector<8x32xf32>
    %142 = vector.extract_strided_slice %138 {offsets = [0, 32], sizes = [8, 32], strides = [1, 1]} : vector<8x96xf32> to vector<8x32xf32>
    %143 = vector.extract_strided_slice %138 {offsets = [0, 64], sizes = [8, 32], strides = [1, 1]} : vector<8x96xf32> to vector<8x32xf32>
    %144 = arith.mulf %142, %96 : vector<8x32xf32>
    %145 = arith.mulf %141, %140 : vector<8x32xf32>
    %146 = arith.addf %144, %145 : vector<8x32xf32>
    %147 = math.tanh %146 : vector<8x32xf32>
    %148 = arith.mulf %143, %147 : vector<8x32xf32>
    %149 = arith.mulf %128, %148 : vector<8x32xf32>
    %150 = arith.mulf %129, %93 : vector<8x32xf32>
    %151 = arith.addf %149, %150 : vector<8x32xf32>
    %152 = arith.mulf %128, %146 : vector<8x32xf32>
    %153 = arith.mulf %129, %96 : vector<8x32xf32>
    %154 = arith.addf %152, %153 : vector<8x32xf32>
    %155 = arith.mulf %128, %148 : vector<8x32xf32>
    %c16 = arith.constant 16 : index
    %c0_28 = arith.constant 0 : index
    %156 = vector.load %arg14[%c16, %c0_28] : memref<64x32xf32, #tpu.memory_space<vmem>>, vector<8x32xf32>
    tpu.vector_store %arg14[%c16, %c0_28], %155 {strides = array<i32>} : memref<64x32xf32, #tpu.memory_space<vmem>>, vector<8x32xf32>,
    %157 = vector.extract_strided_slice %8 {offsets = [40, 0], sizes = [8, 32], strides = [1, 1]} : vector<64x32xf32> to vector<8x32xf32>
    %158 = vector.extract_strided_slice %10 {offsets = [40, 0], sizes = [8, 32], strides = [1, 1]} : vector<64x32xf32> to vector<8x32xf32>
    %159 = vector.extract_strided_slice %5 {offsets = [40, 128], sizes = [8, 128], strides = [1, 1]} : vector<64x256xf32> to vector<8x128xf32>
    %cst_29 = arith.constant dense<0.000000e+00> : vector<8x128xf32>
    %160 = tpu.matmul %122, %7, %cst_29 {dimension_numbers = #tpu.dot_dimension_numbers<[1], [0], [0], [1], [0, 0, 1, 1], [], []>} : vector<8x32xf32>, vector<32x128xf32>, vector<8x128xf32> -> vector<8x128xf32>
    %161 = arith.addf %159, %160 : vector<8x128xf32>
    %162 = vector.extract_strided_slice %161 {offsets = [0, 0], sizes = [8, 96], strides = [1, 1]} : vector<8x128xf32> to vector<8x96xf32>
    %163 = arith.negf %162 : vector<8x96xf32>
    %164 = math.exp %163 : vector<8x96xf32>
    %cst_30 = arith.constant 1.000000e+00 : f32
    %165 = vector.broadcast %cst_30 : f32 to vector<8x96xf32>
    %166 = arith.addf %165, %164 : vector<8x96xf32>
    %167 = arith.divf %165, %166 : vector<8x96xf32>
    %168 = vector.extract_strided_slice %161 {offsets = [0, 96], sizes = [8, 32], strides = [1, 1]} : vector<8x128xf32> to vector<8x32xf32>
    %169 = math.tanh %168 : vector<8x32xf32>
    %170 = vector.extract_strided_slice %167 {offsets = [0, 0], sizes = [8, 32], strides = [1, 1]} : vector<8x96xf32> to vector<8x32xf32>
    %171 = vector.extract_strided_slice %167 {offsets = [0, 32], sizes = [8, 32], strides = [1, 1]} : vector<8x96xf32> to vector<8x32xf32>
    %172 = vector.extract_strided_slice %167 {offsets = [0, 64], sizes = [8, 32], strides = [1, 1]} : vector<8x96xf32> to vector<8x32xf32>
    %173 = arith.mulf %171, %125 : vector<8x32xf32>
    %174 = arith.mulf %170, %169 : vector<8x32xf32>
    %175 = arith.addf %173, %174 : vector<8x32xf32>
    %176 = math.tanh %175 : vector<8x32xf32>
    %177 = arith.mulf %172, %176 : vector<8x32xf32>
    %178 = arith.mulf %157, %177 : vector<8x32xf32>
    %179 = arith.mulf %158, %122 : vector<8x32xf32>
    %180 = arith.addf %178, %179 : vector<8x32xf32>
    %181 = arith.mulf %157, %175 : vector<8x32xf32>
    %182 = arith.mulf %158, %125 : vector<8x32xf32>
    %183 = arith.addf %181, %182 : vector<8x32xf32>
    %184 = arith.mulf %157, %177 : vector<8x32xf32>
    %c40 = arith.constant 40 : index
    %c0_31 = arith.constant 0 : index
    %185 = vector.load %arg15[%c40, %c0_31] : memref<64x32xf32, #tpu.memory_space<vmem>>, vector<8x32xf32>
    tpu.vector_store %arg15[%c40, %c0_31], %184 {strides = array<i32>} : memref<64x32xf32, #tpu.memory_space<vmem>>, vector<8x32xf32>,
    %186 = vector.extract_strided_slice %8 {offsets = [24, 0], sizes = [8, 32], strides = [1, 1]} : vector<64x32xf32> to vector<8x32xf32>
    %187 = vector.extract_strided_slice %10 {offsets = [24, 0], sizes = [8, 32], strides = [1, 1]} : vector<64x32xf32> to vector<8x32xf32>
    %188 = vector.extract_strided_slice %5 {offsets = [24, 0], sizes = [8, 128], strides = [1, 1]} : vector<64x256xf32> to vector<8x128xf32>
    %cst_32 = arith.constant dense<0.000000e+00> : vector<8x128xf32>
    %189 = tpu.matmul %151, %6, %cst_32 {dimension_numbers = #tpu.dot_dimension_numbers<[1], [0], [0], [1], [0, 0, 1, 1], [], []>} : vector<8x32xf32>, vector<32x128xf32>, vector<8x128xf32> -> vector<8x128xf32>
    %190 = arith.addf %188, %189 : vector<8x128xf32>
    %191 = vector.extract_strided_slice %190 {offsets = [0, 0], sizes = [8, 96], strides = [1, 1]} : vector<8x128xf32> to vector<8x96xf32>
    %192 = arith.negf %191 : vector<8x96xf32>
    %193 = math.exp %192 : vector<8x96xf32>
    %cst_33 = arith.constant 1.000000e+00 : f32
    %194 = vector.broadcast %cst_33 : f32 to vector<8x96xf32>
    %195 = arith.addf %194, %193 : vector<8x96xf32>
    %196 = arith.divf %194, %195 : vector<8x96xf32>
    %197 = vector.extract_strided_slice %190 {offsets = [0, 96], sizes = [8, 32], strides = [1, 1]} : vector<8x128xf32> to vector<8x32xf32>
    %198 = math.tanh %197 : vector<8x32xf32>
    %199 = vector.extract_strided_slice %196 {offsets = [0, 0], sizes = [8, 32], strides = [1, 1]} : vector<8x96xf32> to vector<8x32xf32>
    %200 = vector.extract_strided_slice %196 {offsets = [0, 32], sizes = [8, 32], strides = [1, 1]} : vector<8x96xf32> to vector<8x32xf32>
    %201 = vector.extract_strided_slice %196 {offsets = [0, 64], sizes = [8, 32], strides = [1, 1]} : vector<8x96xf32> to vector<8x32xf32>
    %202 = arith.mulf %200, %154 : vector<8x32xf32>
    %203 = arith.mulf %199, %198 : vector<8x32xf32>
    %204 = arith.addf %202, %203 : vector<8x32xf32>
    %205 = math.tanh %204 : vector<8x32xf32>
    %206 = arith.mulf %201, %205 : vector<8x32xf32>
    %207 = arith.mulf %186, %206 : vector<8x32xf32>
    %208 = arith.mulf %187, %151 : vector<8x32xf32>
    %209 = arith.addf %207, %208 : vector<8x32xf32>
    %210 = arith.mulf %186, %204 : vector<8x32xf32>
    %211 = arith.mulf %187, %154 : vector<8x32xf32>
    %212 = arith.addf %210, %211 : vector<8x32xf32>
    %213 = arith.mulf %186, %206 : vector<8x32xf32>
    %c24 = arith.constant 24 : index
    %c0_34 = arith.constant 0 : index
    %214 = vector.load %arg14[%c24, %c0_34] : memref<64x32xf32, #tpu.memory_space<vmem>>, vector<8x32xf32>
    tpu.vector_store %arg14[%c24, %c0_34], %213 {strides = array<i32>} : memref<64x32xf32, #tpu.memory_space<vmem>>, vector<8x32xf32>,
    %215 = vector.extract_strided_slice %8 {offsets = [32, 0], sizes = [8, 32], strides = [1, 1]} : vector<64x32xf32> to vector<8x32xf32>
    %216 = vector.extract_strided_slice %10 {offsets = [32, 0], sizes = [8, 32], strides = [1, 1]} : vector<64x32xf32> to vector<8x32xf32>
    %217 = vector.extract_strided_slice %5 {offsets = [32, 128], sizes = [8, 128], strides = [1, 1]} : vector<64x256xf32> to vector<8x128xf32>
    %cst_35 = arith.constant dense<0.000000e+00> : vector<8x128xf32>
    %218 = tpu.matmul %180, %7, %cst_35 {dimension_numbers = #tpu.dot_dimension_numbers<[1], [0], [0], [1], [0, 0, 1, 1], [], []>} : vector<8x32xf32>, vector<32x128xf32>, vector<8x128xf32> -> vector<8x128xf32>
    %219 = arith.addf %217, %218 : vector<8x128xf32>
    %220 = vector.extract_strided_slice %219 {offsets = [0, 0], sizes = [8, 96], strides = [1, 1]} : vector<8x128xf32> to vector<8x96xf32>
    %221 = arith.negf %220 : vector<8x96xf32>
    %222 = math.exp %221 : vector<8x96xf32>
    %cst_36 = arith.constant 1.000000e+00 : f32
    %223 = vector.broadcast %cst_36 : f32 to vector<8x96xf32>
    %224 = arith.addf %223, %222 : vector<8x96xf32>
    %225 = arith.divf %223, %224 : vector<8x96xf32>
    %226 = vector.extract_strided_slice %219 {offsets = [0, 96], sizes = [8, 32], strides = [1, 1]} : vector<8x128xf32> to vector<8x32xf32>
    %227 = math.tanh %226 : vector<8x32xf32>
    %228 = vector.extract_strided_slice %225 {offsets = [0, 0], sizes = [8, 32], strides = [1, 1]} : vector<8x96xf32> to vector<8x32xf32>
    %229 = vector.extract_strided_slice %225 {offsets = [0, 32], sizes = [8, 32], strides = [1, 1]} : vector<8x96xf32> to vector<8x32xf32>
    %230 = vector.extract_strided_slice %225 {offsets = [0, 64], sizes = [8, 32], strides = [1, 1]} : vector<8x96xf32> to vector<8x32xf32>
    %231 = arith.mulf %229, %183 : vector<8x32xf32>
    %232 = arith.mulf %228, %227 : vector<8x32xf32>
    %233 = arith.addf %231, %232 : vector<8x32xf32>
    %234 = math.tanh %233 : vector<8x32xf32>
    %235 = arith.mulf %230, %234 : vector<8x32xf32>
    %236 = arith.mulf %215, %235 : vector<8x32xf32>
    %237 = arith.mulf %216, %180 : vector<8x32xf32>
    %238 = arith.addf %236, %237 : vector<8x32xf32>
    %239 = arith.mulf %215, %233 : vector<8x32xf32>
    %240 = arith.mulf %216, %183 : vector<8x32xf32>
    %241 = arith.addf %239, %240 : vector<8x32xf32>
    %242 = arith.mulf %215, %235 : vector<8x32xf32>
    %c32 = arith.constant 32 : index
    %c0_37 = arith.constant 0 : index
    %243 = vector.load %arg15[%c32, %c0_37] : memref<64x32xf32, #tpu.memory_space<vmem>>, vector<8x32xf32>
    tpu.vector_store %arg15[%c32, %c0_37], %242 {strides = array<i32>} : memref<64x32xf32, #tpu.memory_space<vmem>>, vector<8x32xf32>,
    %244 = vector.extract_strided_slice %8 {offsets = [32, 0], sizes = [8, 32], strides = [1, 1]} : vector<64x32xf32> to vector<8x32xf32>
    %245 = vector.extract_strided_slice %10 {offsets = [32, 0], sizes = [8, 32], strides = [1, 1]} : vector<64x32xf32> to vector<8x32xf32>
    %246 = vector.extract_strided_slice %5 {offsets = [32, 0], sizes = [8, 128], strides = [1, 1]} : vector<64x256xf32> to vector<8x128xf32>
    %cst_38 = arith.constant dense<0.000000e+00> : vector<8x128xf32>
    %247 = tpu.matmul %209, %6, %cst_38 {dimension_numbers = #tpu.dot_dimension_numbers<[1], [0], [0], [1], [0, 0, 1, 1], [], []>} : vector<8x32xf32>, vector<32x128xf32>, vector<8x128xf32> -> vector<8x128xf32>
    %248 = arith.addf %246, %247 : vector<8x128xf32>
    %249 = vector.extract_strided_slice %248 {offsets = [0, 0], sizes = [8, 96], strides = [1, 1]} : vector<8x128xf32> to vector<8x96xf32>
    %250 = arith.negf %249 : vector<8x96xf32>
    %251 = math.exp %250 : vector<8x96xf32>
    %cst_39 = arith.constant 1.000000e+00 : f32
    %252 = vector.broadcast %cst_39 : f32 to vector<8x96xf32>
    %253 = arith.addf %252, %251 : vector<8x96xf32>
    %254 = arith.divf %252, %253 : vector<8x96xf32>
    %255 = vector.extract_strided_slice %248 {offsets = [0, 96], sizes = [8, 32], strides = [1, 1]} : vector<8x128xf32> to vector<8x32xf32>
    %256 = math.tanh %255 : vector<8x32xf32>
    %257 = vector.extract_strided_slice %254 {offsets = [0, 0], sizes = [8, 32], strides = [1, 1]} : vector<8x96xf32> to vector<8x32xf32>
    %258 = vector.extract_strided_slice %254 {offsets = [0, 32], sizes = [8, 32], strides = [1, 1]} : vector<8x96xf32> to vector<8x32xf32>
    %259 = vector.extract_strided_slice %254 {offsets = [0, 64], sizes = [8, 32], strides = [1, 1]} : vector<8x96xf32> to vector<8x32xf32>
    %260 = arith.mulf %258, %212 : vector<8x32xf32>
    %261 = arith.mulf %257, %256 : vector<8x32xf32>
    %262 = arith.addf %260, %261 : vector<8x32xf32>
    %263 = math.tanh %262 : vector<8x32xf32>
    %264 = arith.mulf %259, %263 : vector<8x32xf32>
    %265 = arith.mulf %244, %264 : vector<8x32xf32>
    %266 = arith.mulf %245, %209 : vector<8x32xf32>
    %267 = arith.addf %265, %266 : vector<8x32xf32>
    %268 = arith.mulf %244, %262 : vector<8x32xf32>
    %269 = arith.mulf %245, %212 : vector<8x32xf32>
    %270 = arith.addf %268, %269 : vector<8x32xf32>
    %271 = arith.mulf %244, %264 : vector<8x32xf32>
    %c32_40 = arith.constant 32 : index
    %c0_41 = arith.constant 0 : index
    %272 = vector.load %arg14[%c32_40, %c0_41] : memref<64x32xf32, #tpu.memory_space<vmem>>, vector<8x32xf32>
    tpu.vector_store %arg14[%c32_40, %c0_41], %271 {strides = array<i32>} : memref<64x32xf32, #tpu.memory_space<vmem>>, vector<8x32xf32>,
    %273 = vector.extract_strided_slice %8 {offsets = [24, 0], sizes = [8, 32], strides = [1, 1]} : vector<64x32xf32> to vector<8x32xf32>
    %274 = vector.extract_strided_slice %10 {offsets = [24, 0], sizes = [8, 32], strides = [1, 1]} : vector<64x32xf32> to vector<8x32xf32>
    %275 = vector.extract_strided_slice %5 {offsets = [24, 128], sizes = [8, 128], strides = [1, 1]} : vector<64x256xf32> to vector<8x128xf32>
    %cst_42 = arith.constant dense<0.000000e+00> : vector<8x128xf32>
    %276 = tpu.matmul %238, %7, %cst_42 {dimension_numbers = #tpu.dot_dimension_numbers<[1], [0], [0], [1], [0, 0, 1, 1], [], []>} : vector<8x32xf32>, vector<32x128xf32>, vector<8x128xf32> -> vector<8x128xf32>
    %277 = arith.addf %275, %276 : vector<8x128xf32>
    %278 = vector.extract_strided_slice %277 {offsets = [0, 0], sizes = [8, 96], strides = [1, 1]} : vector<8x128xf32> to vector<8x96xf32>
    %279 = arith.negf %278 : vector<8x96xf32>
    %280 = math.exp %279 : vector<8x96xf32>
    %cst_43 = arith.constant 1.000000e+00 : f32
    %281 = vector.broadcast %cst_43 : f32 to vector<8x96xf32>
    %282 = arith.addf %281, %280 : vector<8x96xf32>
    %283 = arith.divf %281, %282 : vector<8x96xf32>
    %284 = vector.extract_strided_slice %277 {offsets = [0, 96], sizes = [8, 32], strides = [1, 1]} : vector<8x128xf32> to vector<8x32xf32>
    %285 = math.tanh %284 : vector<8x32xf32>
    %286 = vector.extract_strided_slice %283 {offsets = [0, 0], sizes = [8, 32], strides = [1, 1]} : vector<8x96xf32> to vector<8x32xf32>
    %287 = vector.extract_strided_slice %283 {offsets = [0, 32], sizes = [8, 32], strides = [1, 1]} : vector<8x96xf32> to vector<8x32xf32>
    %288 = vector.extract_strided_slice %283 {offsets = [0, 64], sizes = [8, 32], strides = [1, 1]} : vector<8x96xf32> to vector<8x32xf32>
    %289 = arith.mulf %287, %241 : vector<8x32xf32>
    %290 = arith.mulf %286, %285 : vector<8x32xf32>
    %291 = arith.addf %289, %290 : vector<8x32xf32>
    %292 = math.tanh %291 : vector<8x32xf32>
    %293 = arith.mulf %288, %292 : vector<8x32xf32>
    %294 = arith.mulf %273, %293 : vector<8x32xf32>
    %295 = arith.mulf %274, %238 : vector<8x32xf32>
    %296 = arith.addf %294, %295 : vector<8x32xf32>
    %297 = arith.mulf %273, %291 : vector<8x32xf32>
    %298 = arith.mulf %274, %241 : vector<8x32xf32>
    %299 = arith.addf %297, %298 : vector<8x32xf32>
    %300 = arith.mulf %273, %293 : vector<8x32xf32>
    %c24_44 = arith.constant 24 : index
    %c0_45 = arith.constant 0 : index
    %301 = vector.load %arg15[%c24_44, %c0_45] : memref<64x32xf32, #tpu.memory_space<vmem>>, vector<8x32xf32>
    tpu.vector_store %arg15[%c24_44, %c0_45], %300 {strides = array<i32>} : memref<64x32xf32, #tpu.memory_space<vmem>>, vector<8x32xf32>,
    %302 = vector.extract_strided_slice %8 {offsets = [40, 0], sizes = [8, 32], strides = [1, 1]} : vector<64x32xf32> to vector<8x32xf32>
    %303 = vector.extract_strided_slice %10 {offsets = [40, 0], sizes = [8, 32], strides = [1, 1]} : vector<64x32xf32> to vector<8x32xf32>
    %304 = vector.extract_strided_slice %5 {offsets = [40, 0], sizes = [8, 128], strides = [1, 1]} : vector<64x256xf32> to vector<8x128xf32>
    %cst_46 = arith.constant dense<0.000000e+00> : vector<8x128xf32>
    %305 = tpu.matmul %267, %6, %cst_46 {dimension_numbers = #tpu.dot_dimension_numbers<[1], [0], [0], [1], [0, 0, 1, 1], [], []>} : vector<8x32xf32>, vector<32x128xf32>, vector<8x128xf32> -> vector<8x128xf32>
    %306 = arith.addf %304, %305 : vector<8x128xf32>
    %307 = vector.extract_strided_slice %306 {offsets = [0, 0], sizes = [8, 96], strides = [1, 1]} : vector<8x128xf32> to vector<8x96xf32>
    %308 = arith.negf %307 : vector<8x96xf32>
    %309 = math.exp %308 : vector<8x96xf32>
    %cst_47 = arith.constant 1.000000e+00 : f32
    %310 = vector.broadcast %cst_47 : f32 to vector<8x96xf32>
    %311 = arith.addf %310, %309 : vector<8x96xf32>
    %312 = arith.divf %310, %311 : vector<8x96xf32>
    %313 = vector.extract_strided_slice %306 {offsets = [0, 96], sizes = [8, 32], strides = [1, 1]} : vector<8x128xf32> to vector<8x32xf32>
    %314 = math.tanh %313 : vector<8x32xf32>
    %315 = vector.extract_strided_slice %312 {offsets = [0, 0], sizes = [8, 32], strides = [1, 1]} : vector<8x96xf32> to vector<8x32xf32>
    %316 = vector.extract_strided_slice %312 {offsets = [0, 32], sizes = [8, 32], strides = [1, 1]} : vector<8x96xf32> to vector<8x32xf32>
    %317 = vector.extract_strided_slice %312 {offsets = [0, 64], sizes = [8, 32], strides = [1, 1]} : vector<8x96xf32> to vector<8x32xf32>
    %318 = arith.mulf %316, %270 : vector<8x32xf32>
    %319 = arith.mulf %315, %314 : vector<8x32xf32>
    %320 = arith.addf %318, %319 : vector<8x32xf32>
    %321 = math.tanh %320 : vector<8x32xf32>
    %322 = arith.mulf %317, %321 : vector<8x32xf32>
    %323 = arith.mulf %302, %322 : vector<8x32xf32>
    %324 = arith.mulf %303, %267 : vector<8x32xf32>
    %325 = arith.addf %323, %324 : vector<8x32xf32>
    %326 = arith.mulf %302, %320 : vector<8x32xf32>
    %327 = arith.mulf %303, %270 : vector<8x32xf32>
    %328 = arith.addf %326, %327 : vector<8x32xf32>
    %329 = arith.mulf %302, %322 : vector<8x32xf32>
    %c40_48 = arith.constant 40 : index
    %c0_49 = arith.constant 0 : index
    %330 = vector.load %arg14[%c40_48, %c0_49] : memref<64x32xf32, #tpu.memory_space<vmem>>, vector<8x32xf32>
    tpu.vector_store %arg14[%c40_48, %c0_49], %329 {strides = array<i32>} : memref<64x32xf32, #tpu.memory_space<vmem>>, vector<8x32xf32>,
    %331 = vector.extract_strided_slice %8 {offsets = [16, 0], sizes = [8, 32], strides = [1, 1]} : vector<64x32xf32> to vector<8x32xf32>
    %332 = vector.extract_strided_slice %10 {offsets = [16, 0], sizes = [8, 32], strides = [1, 1]} : vector<64x32xf32> to vector<8x32xf32>
    %333 = vector.extract_strided_slice %5 {offsets = [16, 128], sizes = [8, 128], strides = [1, 1]} : vector<64x256xf32> to vector<8x128xf32>
    %cst_50 = arith.constant dense<0.000000e+00> : vector<8x128xf32>
    %334 = tpu.matmul %296, %7, %cst_50 {dimension_numbers = #tpu.dot_dimension_numbers<[1], [0], [0], [1], [0, 0, 1, 1], [], []>} : vector<8x32xf32>, vector<32x128xf32>, vector<8x128xf32> -> vector<8x128xf32>
    %335 = arith.addf %333, %334 : vector<8x128xf32>
    %336 = vector.extract_strided_slice %335 {offsets = [0, 0], sizes = [8, 96], strides = [1, 1]} : vector<8x128xf32> to vector<8x96xf32>
    %337 = arith.negf %336 : vector<8x96xf32>
    %338 = math.exp %337 : vector<8x96xf32>
    %cst_51 = arith.constant 1.000000e+00 : f32
    %339 = vector.broadcast %cst_51 : f32 to vector<8x96xf32>
    %340 = arith.addf %339, %338 : vector<8x96xf32>
    %341 = arith.divf %339, %340 : vector<8x96xf32>
    %342 = vector.extract_strided_slice %335 {offsets = [0, 96], sizes = [8, 32], strides = [1, 1]} : vector<8x128xf32> to vector<8x32xf32>
    %343 = math.tanh %342 : vector<8x32xf32>
    %344 = vector.extract_strided_slice %341 {offsets = [0, 0], sizes = [8, 32], strides = [1, 1]} : vector<8x96xf32> to vector<8x32xf32>
    %345 = vector.extract_strided_slice %341 {offsets = [0, 32], sizes = [8, 32], strides = [1, 1]} : vector<8x96xf32> to vector<8x32xf32>
    %346 = vector.extract_strided_slice %341 {offsets = [0, 64], sizes = [8, 32], strides = [1, 1]} : vector<8x96xf32> to vector<8x32xf32>
    %347 = arith.mulf %345, %299 : vector<8x32xf32>
    %348 = arith.mulf %344, %343 : vector<8x32xf32>
    %349 = arith.addf %347, %348 : vector<8x32xf32>
    %350 = math.tanh %349 : vector<8x32xf32>
    %351 = arith.mulf %346, %350 : vector<8x32xf32>
    %352 = arith.mulf %331, %351 : vector<8x32xf32>
    %353 = arith.mulf %332, %296 : vector<8x32xf32>
    %354 = arith.addf %352, %353 : vector<8x32xf32>
    %355 = arith.mulf %331, %349 : vector<8x32xf32>
    %356 = arith.mulf %332, %299 : vector<8x32xf32>
    %357 = arith.addf %355, %356 : vector<8x32xf32>
    %358 = arith.mulf %331, %351 : vector<8x32xf32>
    %c16_52 = arith.constant 16 : index
    %c0_53 = arith.constant 0 : index
    %359 = vector.load %arg15[%c16_52, %c0_53] : memref<64x32xf32, #tpu.memory_space<vmem>>, vector<8x32xf32>
    tpu.vector_store %arg15[%c16_52, %c0_53], %358 {strides = array<i32>} : memref<64x32xf32, #tpu.memory_space<vmem>>, vector<8x32xf32>,
    %360 = vector.extract_strided_slice %8 {offsets = [48, 0], sizes = [8, 32], strides = [1, 1]} : vector<64x32xf32> to vector<8x32xf32>
    %361 = vector.extract_strided_slice %10 {offsets = [48, 0], sizes = [8, 32], strides = [1, 1]} : vector<64x32xf32> to vector<8x32xf32>
    %362 = vector.extract_strided_slice %5 {offsets = [48, 0], sizes = [8, 128], strides = [1, 1]} : vector<64x256xf32> to vector<8x128xf32>
    %cst_54 = arith.constant dense<0.000000e+00> : vector<8x128xf32>
    %363 = tpu.matmul %325, %6, %cst_54 {dimension_numbers = #tpu.dot_dimension_numbers<[1], [0], [0], [1], [0, 0, 1, 1], [], []>} : vector<8x32xf32>, vector<32x128xf32>, vector<8x128xf32> -> vector<8x128xf32>
    %364 = arith.addf %362, %363 : vector<8x128xf32>
    %365 = vector.extract_strided_slice %364 {offsets = [0, 0], sizes = [8, 96], strides = [1, 1]} : vector<8x128xf32> to vector<8x96xf32>
    %366 = arith.negf %365 : vector<8x96xf32>
    %367 = math.exp %366 : vector<8x96xf32>
    %cst_55 = arith.constant 1.000000e+00 : f32
    %368 = vector.broadcast %cst_55 : f32 to vector<8x96xf32>
    %369 = arith.addf %368, %367 : vector<8x96xf32>
    %370 = arith.divf %368, %369 : vector<8x96xf32>
    %371 = vector.extract_strided_slice %364 {offsets = [0, 96], sizes = [8, 32], strides = [1, 1]} : vector<8x128xf32> to vector<8x32xf32>
    %372 = math.tanh %371 : vector<8x32xf32>
    %373 = vector.extract_strided_slice %370 {offsets = [0, 0], sizes = [8, 32], strides = [1, 1]} : vector<8x96xf32> to vector<8x32xf32>
    %374 = vector.extract_strided_slice %370 {offsets = [0, 32], sizes = [8, 32], strides = [1, 1]} : vector<8x96xf32> to vector<8x32xf32>
    %375 = vector.extract_strided_slice %370 {offsets = [0, 64], sizes = [8, 32], strides = [1, 1]} : vector<8x96xf32> to vector<8x32xf32>
    %376 = arith.mulf %374, %328 : vector<8x32xf32>
    %377 = arith.mulf %373, %372 : vector<8x32xf32>
    %378 = arith.addf %376, %377 : vector<8x32xf32>
    %379 = math.tanh %378 : vector<8x32xf32>
    %380 = arith.mulf %375, %379 : vector<8x32xf32>
    %381 = arith.mulf %360, %380 : vector<8x32xf32>
    %382 = arith.mulf %361, %325 : vector<8x32xf32>
    %383 = arith.addf %381, %382 : vector<8x32xf32>
    %384 = arith.mulf %360, %378 : vector<8x32xf32>
    %385 = arith.mulf %361, %328 : vector<8x32xf32>
    %386 = arith.addf %384, %385 : vector<8x32xf32>
    %387 = arith.mulf %360, %380 : vector<8x32xf32>
    %c48_56 = arith.constant 48 : index
    %c0_57 = arith.constant 0 : index
    %388 = vector.load %arg14[%c48_56, %c0_57] : memref<64x32xf32, #tpu.memory_space<vmem>>, vector<8x32xf32>
    tpu.vector_store %arg14[%c48_56, %c0_57], %387 {strides = array<i32>} : memref<64x32xf32, #tpu.memory_space<vmem>>, vector<8x32xf32>,
    %389 = vector.extract_strided_slice %8 {offsets = [8, 0], sizes = [8, 32], strides = [1, 1]} : vector<64x32xf32> to vector<8x32xf32>
    %390 = vector.extract_strided_slice %10 {offsets = [8, 0], sizes = [8, 32], strides = [1, 1]} : vector<64x32xf32> to vector<8x32xf32>
    %391 = vector.extract_strided_slice %5 {offsets = [8, 128], sizes = [8, 128], strides = [1, 1]} : vector<64x256xf32> to vector<8x128xf32>
    %cst_58 = arith.constant dense<0.000000e+00> : vector<8x128xf32>
    %392 = tpu.matmul %354, %7, %cst_58 {dimension_numbers = #tpu.dot_dimension_numbers<[1], [0], [0], [1], [0, 0, 1, 1], [], []>} : vector<8x32xf32>, vector<32x128xf32>, vector<8x128xf32> -> vector<8x128xf32>
    %393 = arith.addf %391, %392 : vector<8x128xf32>
    %394 = vector.extract_strided_slice %393 {offsets = [0, 0], sizes = [8, 96], strides = [1, 1]} : vector<8x128xf32> to vector<8x96xf32>
    %395 = arith.negf %394 : vector<8x96xf32>
    %396 = math.exp %395 : vector<8x96xf32>
    %cst_59 = arith.constant 1.000000e+00 : f32
    %397 = vector.broadcast %cst_59 : f32 to vector<8x96xf32>
    %398 = arith.addf %397, %396 : vector<8x96xf32>
    %399 = arith.divf %397, %398 : vector<8x96xf32>
    %400 = vector.extract_strided_slice %393 {offsets = [0, 96], sizes = [8, 32], strides = [1, 1]} : vector<8x128xf32> to vector<8x32xf32>
    %401 = math.tanh %400 : vector<8x32xf32>
    %402 = vector.extract_strided_slice %399 {offsets = [0, 0], sizes = [8, 32], strides = [1, 1]} : vector<8x96xf32> to vector<8x32xf32>
    %403 = vector.extract_strided_slice %399 {offsets = [0, 32], sizes = [8, 32], strides = [1, 1]} : vector<8x96xf32> to vector<8x32xf32>
    %404 = vector.extract_strided_slice %399 {offsets = [0, 64], sizes = [8, 32], strides = [1, 1]} : vector<8x96xf32> to vector<8x32xf32>
    %405 = arith.mulf %403, %357 : vector<8x32xf32>
    %406 = arith.mulf %402, %401 : vector<8x32xf32>
    %407 = arith.addf %405, %406 : vector<8x32xf32>
    %408 = math.tanh %407 : vector<8x32xf32>
    %409 = arith.mulf %404, %408 : vector<8x32xf32>
    %410 = arith.mulf %389, %409 : vector<8x32xf32>
    %411 = arith.mulf %390, %354 : vector<8x32xf32>
    %412 = arith.addf %410, %411 : vector<8x32xf32>
    %413 = arith.mulf %389, %407 : vector<8x32xf32>
    %414 = arith.mulf %390, %357 : vector<8x32xf32>
    %415 = arith.addf %413, %414 : vector<8x32xf32>
    %416 = arith.mulf %389, %409 : vector<8x32xf32>
    %c8_60 = arith.constant 8 : index
    %c0_61 = arith.constant 0 : index
    %417 = vector.load %arg15[%c8_60, %c0_61] : memref<64x32xf32, #tpu.memory_space<vmem>>, vector<8x32xf32>
    tpu.vector_store %arg15[%c8_60, %c0_61], %416 {strides = array<i32>} : memref<64x32xf32, #tpu.memory_space<vmem>>, vector<8x32xf32>,
    %418 = vector.extract_strided_slice %8 {offsets = [56, 0], sizes = [8, 32], strides = [1, 1]} : vector<64x32xf32> to vector<8x32xf32>
    %419 = vector.extract_strided_slice %10 {offsets = [56, 0], sizes = [8, 32], strides = [1, 1]} : vector<64x32xf32> to vector<8x32xf32>
    %420 = vector.extract_strided_slice %5 {offsets = [56, 0], sizes = [8, 128], strides = [1, 1]} : vector<64x256xf32> to vector<8x128xf32>
    %cst_62 = arith.constant dense<0.000000e+00> : vector<8x128xf32>
    %421 = tpu.matmul %383, %6, %cst_62 {dimension_numbers = #tpu.dot_dimension_numbers<[1], [0], [0], [1], [0, 0, 1, 1], [], []>} : vector<8x32xf32>, vector<32x128xf32>, vector<8x128xf32> -> vector<8x128xf32>
    %422 = arith.addf %420, %421 : vector<8x128xf32>
    %423 = vector.extract_strided_slice %422 {offsets = [0, 0], sizes = [8, 96], strides = [1, 1]} : vector<8x128xf32> to vector<8x96xf32>
    %424 = arith.negf %423 : vector<8x96xf32>
    %425 = math.exp %424 : vector<8x96xf32>
    %cst_63 = arith.constant 1.000000e+00 : f32
    %426 = vector.broadcast %cst_63 : f32 to vector<8x96xf32>
    %427 = arith.addf %426, %425 : vector<8x96xf32>
    %428 = arith.divf %426, %427 : vector<8x96xf32>
    %429 = vector.extract_strided_slice %422 {offsets = [0, 96], sizes = [8, 32], strides = [1, 1]} : vector<8x128xf32> to vector<8x32xf32>
    %430 = math.tanh %429 : vector<8x32xf32>
    %431 = vector.extract_strided_slice %428 {offsets = [0, 0], sizes = [8, 32], strides = [1, 1]} : vector<8x96xf32> to vector<8x32xf32>
    %432 = vector.extract_strided_slice %428 {offsets = [0, 32], sizes = [8, 32], strides = [1, 1]} : vector<8x96xf32> to vector<8x32xf32>
    %433 = vector.extract_strided_slice %428 {offsets = [0, 64], sizes = [8, 32], strides = [1, 1]} : vector<8x96xf32> to vector<8x32xf32>
    %434 = arith.mulf %432, %386 : vector<8x32xf32>
    %435 = arith.mulf %431, %430 : vector<8x32xf32>
    %436 = arith.addf %434, %435 : vector<8x32xf32>
    %437 = math.tanh %436 : vector<8x32xf32>
    %438 = arith.mulf %433, %437 : vector<8x32xf32>
    %439 = arith.mulf %418, %438 : vector<8x32xf32>
    %440 = arith.mulf %419, %383 : vector<8x32xf32>
    %441 = arith.addf %439, %440 : vector<8x32xf32>
    %442 = arith.mulf %418, %438 : vector<8x32xf32>
    %c56_64 = arith.constant 56 : index
    %c0_65 = arith.constant 0 : index
    %443 = vector.load %arg14[%c56_64, %c0_65] : memref<64x32xf32, #tpu.memory_space<vmem>>, vector<8x32xf32>
    tpu.vector_store %arg14[%c56_64, %c0_65], %442 {strides = array<i32>} : memref<64x32xf32, #tpu.memory_space<vmem>>, vector<8x32xf32>,
    %444 = vector.extract_strided_slice %8 {offsets = [0, 0], sizes = [8, 32], strides = [1, 1]} : vector<64x32xf32> to vector<8x32xf32>
    %445 = vector.extract_strided_slice %10 {offsets = [0, 0], sizes = [8, 32], strides = [1, 1]} : vector<64x32xf32> to vector<8x32xf32>
    %446 = vector.extract_strided_slice %5 {offsets = [0, 128], sizes = [8, 128], strides = [1, 1]} : vector<64x256xf32> to vector<8x128xf32>
    %cst_66 = arith.constant dense<0.000000e+00> : vector<8x128xf32>
    %447 = tpu.matmul %412, %7, %cst_66 {dimension_numbers = #tpu.dot_dimension_numbers<[1], [0], [0], [1], [0, 0, 1, 1], [], []>} : vector<8x32xf32>, vector<32x128xf32>, vector<8x128xf32> -> vector<8x128xf32>
    %448 = arith.addf %446, %447 : vector<8x128xf32>
    %449 = vector.extract_strided_slice %448 {offsets = [0, 0], sizes = [8, 96], strides = [1, 1]} : vector<8x128xf32> to vector<8x96xf32>
    %450 = arith.negf %449 : vector<8x96xf32>
    %451 = math.exp %450 : vector<8x96xf32>
    %cst_67 = arith.constant 1.000000e+00 : f32
    %452 = vector.broadcast %cst_67 : f32 to vector<8x96xf32>
    %453 = arith.addf %452, %451 : vector<8x96xf32>
    %454 = arith.divf %452, %453 : vector<8x96xf32>
    %455 = vector.extract_strided_slice %448 {offsets = [0, 96], sizes = [8, 32], strides = [1, 1]} : vector<8x128xf32> to vector<8x32xf32>
    %456 = math.tanh %455 : vector<8x32xf32>
    %457 = vector.extract_strided_slice %454 {offsets = [0, 0], sizes = [8, 32], strides = [1, 1]} : vector<8x96xf32> to vector<8x32xf32>
    %458 = vector.extract_strided_slice %454 {offsets = [0, 32], sizes = [8, 32], strides = [1, 1]} : vector<8x96xf32> to vector<8x32xf32>
    %459 = vector.extract_strided_slice %454 {offsets = [0, 64], sizes = [8, 32], strides = [1, 1]} : vector<8x96xf32> to vector<8x32xf32>
    %460 = arith.mulf %458, %415 : vector<8x32xf32>
    %461 = arith.mulf %457, %456 : vector<8x32xf32>
    %462 = arith.addf %460, %461 : vector<8x32xf32>
    %463 = math.tanh %462 : vector<8x32xf32>
    %464 = arith.mulf %459, %463 : vector<8x32xf32>
    %465 = arith.mulf %444, %464 : vector<8x32xf32>
    %466 = arith.mulf %445, %412 : vector<8x32xf32>
    %467 = arith.addf %465, %466 : vector<8x32xf32>
    %468 = arith.mulf %444, %464 : vector<8x32xf32>
    %c0_68 = arith.constant 0 : index
    %c0_69 = arith.constant 0 : index
    %469 = vector.load %arg15[%c0_68, %c0_69] : memref<64x32xf32, #tpu.memory_space<vmem>>, vector<8x32xf32>
    tpu.vector_store %arg15[%c0_68, %c0_69], %468 {strides = array<i32>} : memref<64x32xf32, #tpu.memory_space<vmem>>, vector<8x32xf32>,
    %c0_70 = arith.constant 0 : index
    %c0_71 = arith.constant 0 : index
    %470 = vector.load %arg14[%c0_70, %c0_71] : memref<64x32xf32, #tpu.memory_space<vmem>>, vector<64x32xf32>
    %c0_72 = arith.constant 0 : index
    %c0_73 = arith.constant 0 : index
    %471 = vector.load %arg6[%c0_72, %c0_73] : memref<32x10xf32, #tpu.memory_space<vmem>>, vector<32x10xf32>
    %cst_74 = arith.constant dense<0.000000e+00> : vector<64x10xf32>
    %472 = tpu.matmul %470, %471, %cst_74 {dimension_numbers = #tpu.dot_dimension_numbers<[1], [0], [0], [1], [0, 0, 1, 1], [], []>} : vector<64x32xf32>, vector<32x10xf32>, vector<64x10xf32> -> vector<64x10xf32>
    %c0_75 = arith.constant 0 : index
    %c0_76 = arith.constant 0 : index
    %473 = vector.load %arg15[%c0_75, %c0_76] : memref<64x32xf32, #tpu.memory_space<vmem>>, vector<64x32xf32>
    %c0_77 = arith.constant 0 : index
    %c0_78 = arith.constant 0 : index
    %474 = vector.load %arg7[%c0_77, %c0_78] : memref<32x10xf32, #tpu.memory_space<vmem>>, vector<32x10xf32>
    %cst_79 = arith.constant dense<0.000000e+00> : vector<64x10xf32>
    %475 = tpu.matmul %473, %474, %cst_79 {dimension_numbers = #tpu.dot_dimension_numbers<[1], [0], [0], [1], [0, 0, 1, 1], [], []>} : vector<64x32xf32>, vector<32x10xf32>, vector<64x10xf32> -> vector<64x10xf32>
    %476 = arith.addf %472, %475 : vector<64x10xf32>
    %c0_80 = arith.constant 0 : index
    %c0_81 = arith.constant 0 : index
    %477 = vector.load %arg8[%c0_80, %c0_81] : memref<1x10xf32, #tpu.memory_space<vmem>>, vector<1x10xf32>
    %478 = vector.broadcast %477 : vector<1x10xf32> to vector<64x10xf32>
    %479 = arith.addf %476, %478 : vector<64x10xf32>
    %c0_82 = arith.constant 0 : index
    %c0_83 = arith.constant 0 : index
    %480 = vector.load %arg12[%c0_82, %c0_83] : memref<64x10xf32, #tpu.memory_space<vmem>>, vector<64x10xf32>
    tpu.vector_store %arg12[%c0_82, %c0_83], %479 {strides = array<i32>} : memref<64x10xf32, #tpu.memory_space<vmem>>, vector<64x10xf32>,
    %c0_84 = arith.constant 0 : index
    %c0_85 = arith.constant 0 : index
    %481 = vector.load %arg9[%c0_84, %c0_85] : memref<32x5xf32, #tpu.memory_space<vmem>>, vector<32x5xf32>
    %cst_86 = arith.constant dense<0.000000e+00> : vector<8x5xf32>
    %482 = tpu.matmul %441, %481, %cst_86 {dimension_numbers = #tpu.dot_dimension_numbers<[1], [0], [0], [1], [0, 0, 1, 1], [], []>} : vector<8x32xf32>, vector<32x5xf32>, vector<8x5xf32> -> vector<8x5xf32>
    %c0_87 = arith.constant 0 : index
    %c0_88 = arith.constant 0 : index
    %483 = vector.load %arg10[%c0_87, %c0_88] : memref<32x5xf32, #tpu.memory_space<vmem>>, vector<32x5xf32>
    %cst_89 = arith.constant dense<0.000000e+00> : vector<8x5xf32>
    %484 = tpu.matmul %467, %483, %cst_89 {dimension_numbers = #tpu.dot_dimension_numbers<[1], [0], [0], [1], [0, 0, 1, 1], [], []>} : vector<8x32xf32>, vector<32x5xf32>, vector<8x5xf32> -> vector<8x5xf32>
    %485 = arith.addf %482, %484 : vector<8x5xf32>
    %c0_90 = arith.constant 0 : index
    %c0_91 = arith.constant 0 : index
    %486 = vector.load %arg11[%c0_90, %c0_91] : memref<1x5xf32, #tpu.memory_space<vmem>>, vector<1x5xf32>
    %487 = vector.broadcast %486 : vector<1x5xf32> to vector<8x5xf32>
    %488 = arith.addf %485, %487 : vector<8x5xf32>
    %c0_92 = arith.constant 0 : index
    %c0_93 = arith.constant 0 : index
    %489 = vector.load %arg13[%c0_92, %c0_93] : memref<8x5xf32, #tpu.memory_space<vmem>>, vector<8x5xf32>
    tpu.vector_store %arg13[%c0_92, %c0_93], %488 {strides = array<i32>} : memref<8x5xf32, #tpu.memory_space<vmem>>, vector<8x5xf32>,
    return
  }
}

</mosaic_0001>

<bundles_post_ra>
// kernel: model_ias_forward.1
= control target key start
LH: loop header
LB: loop body
LE: loop exit
PB: predicated region body
PF: predicated region fallthrough
CT: control target
= control target key end

     0   :  { %v3246_v3 = vmov 0.0   ;;  %vm71_vm0 = vcmask 261120   ;;  %v3247_v18 = vmov 0.0|0.0   ;;  %vm3248_vm1 = vmmov 0   ;;  %s3251_s30 = smov 96   ;;  %s4039_s2 = inlined_call_operand.vmem [shape: f32[32,256], index: 2, kind: input, shape index: {}]   ;;  %s4040_s4 = inlined_call_operand.vmem [shape: f32[32,128], index: 4, kind: input, shape index: {}]   ;;  %s4041_s0 = inlined_call_operand.vmem [shape: f32[64,32], index: 0, kind: input, shape index: {}]   ;;  %s4042_s5 = inlined_call_operand.vmem [shape: f32[32,128], index: 5, kind: input, shape index: {}]   ;;  %s4043_s3 = inlined_call_operand.vmem [shape: f32[1,256], index: 3, kind: input, shape index: {}]   ;;  %s4044_s1 = inlined_call_operand.vmem [shape: f32[64,32], index: 1, kind: input, shape index: {}]   ;;  %s4045_s10 = inlined_call_operand.vmem [shape: f32[32,5], index: 10, kind: input, shape index: {}]   ;;  %s4046_s7 = inlined_call_operand.vmem [shape: f32[32,10], index: 7, kind: input, shape index: {}]   ;;  %s4047_s6 = inlined_call_operand.vmem [shape: f32[32,10], index: 6, kind: input, shape index: {}]   ;;  %s4048_s9 = inlined_call_operand.vmem [shape: f32[32,5], index: 9, kind: input, shape index: {}]   ;;  %s4049_s11 = inlined_call_operand.vmem [shape: f32[1,5], index: 11, kind: input, shape index: {}]   ;;  %s4050_s13 = inlined_call_operand.vmem [shape: f32[8,5], index: 13, kind: output, shape index: {1}]   ;;  %s4051_s8 = inlined_call_operand.vmem [shape: f32[1,10], index: 8, kind: input, shape index: {}]   ;;  %s4052_s12 = inlined_call_operand.vmem [shape: f32[64,10], index: 12, kind: output, shape index: {0}]  }
   0x1   :  { %v52_v0 = vld [vmem:[%s4039_s2 + $0x8] sm:$0xff]  ;;  %v54_v1 = vld [vmem:[%s4039_s2 + $0x18] sm:$0xff]  ;;  %v51_v2 = vld [vmem:[%s4039_s2] sm:$0xff]  ;;  %196 = vmatprep.mubr.f32.mxu1 %v3246_v3  ;;  %160 = vmatprep.mubr.f32.mxu0 %v3246_v3  ;;  %v61_v29 = vlaneseq  ;;  %vm2546_vm2 = vcmask 39936   ;;  %vm2375_vm3 = vcmask 80896  }
   0x2   :  { %v2966_v4 = vpack.c.bf16 %v54_v1, %v52_v0  ;;  %v53_v5 = vld [vmem:[%s4039_s2 + $0x10] sm:$0xff]  ;;  %v56_v6 = vld [vmem:[%s4039_s2 + $0x28] sm:$0xff]  ;;  %v58_v7 = vld [vmem:[%s4039_s2 + $0x38] sm:$0xff] }
   0x3   :  { %v2968_v8 = vpack.c.bf16 %v53_v5, %v51_v2  ;;  %v2970_v9 = vpack.c.bf16 %v58_v7, %v56_v6  ;;  %v55_v10 = vld [vmem:[%s4039_s2 + $0x20] sm:$0xff]  ;;  %v57_v11 = vld [vmem:[%s4039_s2 + $0x30] sm:$0xff]  ;;  %v210_v14 = vld [vmem:[%s4040_s4 + $0x8] sm:$0xff]  ;;  %v62_v30 = vshrl.u32 %v61_v29, 7  ;;  %s3250_s2 = smov 64  }
   0x4   :  { %3098 = vmatprep.subr.bf16.mxu1 %v2966_v4  ;;  %2967 = vmatprep.subr.bf16.mxu0 %v2966_v4  ;;  %v2972_v12 = vpack.c.bf16 %v57_v11, %v55_v10  ;;  %v209_v13 = vld [vmem:[%s4040_s4] sm:$0xff]  ;;  %v49_v15 = vld [vmem:[%s4041_s0 + $0x30] sm:$0xff]  ;;  %v212_v20 = vld [vmem:[%s4040_s4 + $0x18] sm:$0xff] }
   0x5   :  { %3100 = vmatpush1.bf16.msra.mxu1 %v2968_v8  ;;  %2969 = vmatpush1.bf16.msra.mxu0 %v2968_v8  ;;  %v3357_v16 = vpack.c.bf16 %v210_v14, %v209_v13  ;;  %v43_v17 = vld [vmem:[%s4041_s0] sm:$0xff]  ;;  %v211_v19 = vld [vmem:[%s4040_s4 + $0x10] sm:$0xff]  ;;  %v50_v21 = vld [vmem:[%s4041_s0 + $0x38] sm:$0xff]  ;;  %v63_v31 = vsub.s32 0, %v62_v30  ;;  %v67_v42 = vsub.s32 1, %v62_v30 }
   0x6   :  { %3099 = vmatprep.subr.bf16.mxu1 %v2970_v9  ;;  %2971 = vmatprep.subr.bf16.mxu0 %v2970_v9  ;;  %v3377_v22 = vpack.c.bf16 %v212_v20, %v211_v19  ;;  %v213_v23 = vld [vmem:[%s4042_s5] sm:$0xff]  ;;  %v214_v24 = vld [vmem:[%s4042_s5 + $0x8] sm:$0xff]  ;;  %v215_v26 = vld [vmem:[%s4042_s5 + $0x10] sm:$0xff] }
   0x7   :  { %v3393_v25 = vpack.c.bf16 %v214_v24, %v213_v23  ;;  %v216_v27 = vld [vmem:[%s4042_s5 + $0x18] sm:$0xff]  ;;  %v59_v32 = vld [vmem:[%s4043_s3] sm:$0x3]  ;;  %s3249_s3 = smov 32   ;;  %v44_v9 = vld [vmem:[%s4041_s0 + $0x8] sm:$0xff] }
   0x8   :  { %v3406_v28 = vpack.c.bf16 %v216_v27, %v215_v26  ;;  %v3429_v37 = vrot.slane %v59_v32, %v63_v31  ;;  %v3434_v45 = vrot.slane %v59_v32, %v67_v42  ;;  %v3455_v14 = vld [vmem:[%s4044_s1] sm:$0xff] }
   0x9   :  { %3101 = vmatpush1.bf16.msra.mxu1 %v2972_v12  ;;  %2973 = vmatpush1.bf16.msra.mxu0 %v2972_v12 }
   0xa   :  { %2974 = vmatprep.subr.bf16.mxu1 %v3247_v18  ;;  %2998 = vmatprep.subr.bf16.mxu0 %v3247_v18 }
   0xc   :  { %2562 = vmatmul.mubr.msk.f32.vlgmr.msra.gmra.mrb[0].mxu1 %vm71_vm0, %v49_v15  ;;  %2556 = vmatmul.mubr.msk.f32.vlgmr.msra.gmra.mrb[0].mxu0 %vm71_vm0, %v43_v17  ;;  %v225_v15 = vsub.f32 1.0, %v3455_v14  ;;  %v3461_v17 = vld [vmem:[%s4044_s1 + $0x38] sm:$0xff] }
   0xd   :  { %2976 = vmatpush3.bf16.msra.mxu1 %v3357_v16  ;;  %202 = vmatprep.mubr.f32.mxu1 %v3246_v3  ;;  %v232_v20 = vsub.f32 1.0, %v3461_v17 }
   0xe   :  { %2977 = vmatprep.subr.bf16.mxu1 %v3247_v18  ;;  %166 = vmatprep.mubr.f32.mxu0 %v3246_v3  ;;  %v336_v19 = vmul.f32 0.0, %v225_v15 }
   0xf   :  { %3000 = vmatpush3.bf16.msra.mxu0 %v3357_v16  ;;  %v445_v26 = vmul.f32 0.0, %v232_v20 }
  0x10   :  { %2563 = vmatmul.mubr.msk.f32.gmra.mrb[2].mxu1 %vm71_vm0, %v50_v21  ;;  %3001 = vmatprep.subr.bf16.mxu0 %v3247_v18 }
  0x11   :  { %2979 = vmatpush3.bf16.msra.mxu1 %v3377_v22  ;;  %2736 = vmatprep.mubr.msk.f32.mxu1 %vm3248_vm1, %v3246_v3 }
  0x12   :  { %2980 = vmatprep.subr.bf16.mxu1 %v3247_v18  ;;  %2557 = vmatmul.mubr.msk.f32.gmra.mrb[2].mxu0 %vm71_vm0, %v44_v9 }
  0x13   :  { %3003 = vmatpush3.bf16.msra.mxu0 %v3377_v22  ;;  %172 = vmatprep.mubr.f32.mxu0 %v3246_v3 }
  0x14   :  { %2737 = vmatmul.mubr.f32.vlgmr.msra.gmra.mrb[4].mxu1 %v3246_v3  ;;  %3010 = vmatprep.subr.bf16.mxu0 %v3247_v18 }
  0x15   :  { %2982 = vmatpush3.bf16.msra.mxu1 %v3393_v25  ;;  %2747 = vmatprep.mubr.msk.f32.mxu1 %vm3248_vm1, %v3246_v3 }
  0x16   :  { %2983 = vmatprep.subr.bf16.mxu1 %v3247_v18 }
  0x19   :  { %2985 = vmatpush3.bf16.msra.mxu1 %v3406_v28 }
  0x1a   :  { %2986 = vmatprep.subr.bf16.mxu1 %v3247_v18 }
  0x1c   :  { %2748 = vmatmul.mubr.f32.vlgmr.msra.gmra.mrb[6].mxu1 %v3246_v3 }
  0x1d   :  { %2988 = vmatpush3.bf16.msra.mxu1 %v3357_v16  ;;  %2758 = vmatprep.mubr.msk.f32.mxu1 %vm3248_vm1, %v3246_v3 }
  0x1e   :  { %2989 = vmatprep.subr.bf16.mxu1 %v3247_v18 }
  0x21   :  { %2991 = vmatpush3.bf16.msra.mxu1 %v3377_v22 }
  0x22   :  { %2992 = vmatprep.subr.bf16.mxu1 %v3247_v18 }
  0xdf   :  { %v3423_v33 = vpop.f32.mrb[0].mxu1  ;;  %v162_v34 = vpop.f32.mrb[0].mxu0 }
  0xe0   :  { %v3425_v35 = vpop.f32.mrb[1].mxu1  ;;  %v3427_v36 = vpop.f32.mrb[1].mxu0  ;;  %v163_v40 = vadd.f32 %v162_v34, %v3429_v37 }
  0xe3   :  { %v3431_v38 = vpop.f32.mrb[2].mxu1 }
  0xe4   :  { %v206_v39 = vpop.f32.mrb[3].mxu1 }
  0xe5   :  { %v207_v46 = vadd.f32 %v206_v39, %v3434_v45  ;;  %v168_v42 = vpop.f32.mrb[2].mxu0 }
  0xe7   :  { %v302_v41 = vpop.f32.mrb[4].mxu1 }
  0xe8   :  { %v306_v43 = vadd.f32 %v302_v41, %v163_v40  ;;  %v2738_v44 = vpop.f32.mrb[5].mxu1 }
  0xe9   :  { %v169_v44 = vadd.f32 %v168_v42, %v3429_v37 }
  0xea   :  { %3116 = vtanh.f32 %v306_v43  ;;  %v2564_v52 = vmul.f32 -1.442695, %v306_v43  ;;  %v3502_v43 = vpop.f32.mrb[3].mxu0 }
  0xef   :  { %v411_v47 = vpop.f32.mrb[6].mxu1 }
  0xf0   :  { %v415_v48 = vadd.f32 %v411_v47, %v207_v46  ;;  %v2749_v49 = vpop.f32.mrb[7].mxu1 }
  0xf1   :  { %v201_v49 = vadd.f32 %v3425_v35, %v3434_v45 }
  0xf2   :  { %3118 = vtanh.f32 %v415_v48  ;;  %v2565_v53 = vmul.f32 -1.442695, %v415_v48 }
  0xf3   :  { %3120 = vpow2.f32 %v2564_v52 }
  0xf4   :  { %v3117_v50 = vpop.eup %3116  ;;  %3122 = vpow2.f32 %v2565_v53 }
  0xf5   :  { %316 = vrot.lane.b32.xlu0 %v3117_v50, %s3249_s3 }
  0xfc   :  { %v3119_v51 = vpop.eup %3118 }
  0xfd   :  { %425 = vrot.lane.b32.xlu0 %v3119_v51, %s3249_s3  ;;  %v3121_v54 = vpop.eup %3120 }
  0xfe   :  { %v310_v55 = vadd.f32 1.0, %v3121_v54  ;;  %v3123_v56 = vpop.eup %3122 }
  0xff   :  { %v419_v57 = vadd.f32 1.0, %v3123_v56 }
 0x100   :  { %3124 = vrcp.f32 %v310_v55 }
 0x101   :  { %3126 = vrcp.f32 %v419_v57 }
 0x10a   :  { %v3125_v58 = vpop.eup %3124 }
 0x10b   :  { %v3127_v61 = vpop.eup %3126  ;;  %v314_v0 = vmul.f32 0.0, %v3125_v58 }
 0x10c   :  { %v423_v4 = vmul.f32 0.0, %v3127_v61 }
 0x167   :  { %v317_v59 = vpop.permute.xlu0 %316 }
 0x168   :  { %v319_v60 = vmul.f32 %v3125_v58, %v317_v59 }
 0x16a   :  { %321 = vrot.lane.b32.xlu1 %v319_v60, %s3249_s3 }
 0x16f   :  { %v426_v62 = vpop.permute.xlu0 %425 }
 0x170   :  { %v428_v63 = vmul.f32 %v3127_v61, %v426_v62 }
 0x172   :  { %430 = vrot.lane.b32.xlu1 %v428_v63, %s3249_s3 }
 0x1dc   :  { %v322_v1 = vpop.permute.xlu1 %321 }
 0x1dd   :  { %v324_v2 = vadd.f32 %v322_v1, %v314_v0 }
 0x1df   :  { %3128 = vtanh.f32 %v324_v2 }
 0x1e4   :  { %v431_v5 = vpop.permute.xlu1 %430 }
 0x1e5   :  { %v433_v6 = vadd.f32 %v431_v5, %v423_v4 }
 0x1e7   :  { %3130 = vtanh.f32 %v433_v6 }
 0x1e9   :  { %v3129_v7 = vpop.eup %3128 }
 0x1ea   :  { %327 = vrot.lane.b32.xlu0 %v3129_v7, %s3249_s3 }
 0x1f1   :  { %v3131_v8 = vpop.eup %3130 }
 0x1f2   :  { %436 = vrot.lane.b32.xlu1 %v3131_v8, %s3249_s3 }
 0x25c   :  { %v328_v10 = vpop.permute.xlu0 %327 }
 0x25d   :  { %v330_v11 = vmul.f32 %v3125_v58, %v328_v10 }
 0x25f   :  { %332 = vrot.lane.b32.xlu0 %v330_v11, %s3250_s2  ;;  %v45_v11 = vld [vmem:[%s4041_s0 + $0x10] sm:$0xff] }
 0x260   :  { %2558 = vmatmul.mubr.msk.f32.gmra.mrb[4].mxu0 %vm71_vm0, %v45_v11 }
 0x261   :  { %178 = vmatprep.mubr.f32.mxu0 %v3246_v3 }
 0x263   :  { %448 = vrot.lane.b32.xlu0 %v433_v6, %s3251_s30 }
 0x264   :  { %v437_v12 = vpop.permute.xlu1 %436 }
 0x265   :  { %v439_v13 = vmul.f32 %v3127_v61, %v437_v12 }
 0x267   :  { %441 = vrot.lane.b32.xlu1 %v439_v13, %s3250_s2  ;;  %339 = vrot.lane.b32.xlu0 %v324_v2, %s3251_s30  ;;  %v46_v13 = vld [vmem:[%s4041_s0 + $0x18] sm:$0xff] }
 0x268   :  { %2559 = vmatmul.mubr.msk.f32.gmra.mrb[6].mxu0 %vm71_vm0, %v46_v13 }
 0x269   :  { %184 = vmatprep.mubr.f32.mxu0 %v3246_v3 }
 0x2d1   :  { %v333_v21 = vpop.permute.xlu0 %332 }
 0x2d2   :  { %v335_v23 = vmul.f32 %v333_v21, %v3455_v14  ;;  %v47_v21 = vld [vmem:[%s4041_s0 + $0x20] sm:$0xff] }
 0x2d3   :  { %2560 = vmatmul.mubr.msk.f32.gmra.mrb[8].mxu0 %vm71_vm0, %v47_v21 }
 0x2d4   :  { %v3467_v24 = vadd.f32 %v336_v19, %v335_v23  ;;  %344 = vst.msk [vmem:[#allocation2] sm:$0xff] %vm71_vm0, %v335_v23  ;;  %190 = vmatprep.mubr.f32.mxu0 %v3246_v3  ;;  %v48_v23 = vld [vmem:[%s4041_s0 + $0x28] sm:$0xff] }
 0x2d5   :  { %v449_v27 = vpop.permute.xlu0 %448 }
 0x2d6   :  { %v451_v29 = vmul.f32 %v449_v27, %v3461_v17  ;;  %2759 = vmatmul.mubr.msk.f32.vlgmr.msra.gmra.mrb[8].mxu1 %vm71_vm0, %v3467_v24 }
 0x2d7   :  { %2994 = vmatpush3.bf16.msra.mxu1 %v3393_v25  ;;  %2769 = vmatprep.mubr.msk.f32.mxu1 %vm3248_vm1, %v3246_v3 }
 0x2d8   :  { %v3478_v30 = vadd.f32 %v451_v29, %v445_v26  ;;  %2995 = vmatprep.subr.bf16.mxu1 %v3247_v18  ;;  %2561 = vmatmul.mubr.msk.f32.gmra.mrb[10].mxu0 %vm71_vm0, %v48_v23 }
 0x2d9   :  { %v442_v31 = vpop.permute.xlu1 %441  ;;  %v340_v32 = vpop.permute.xlu0 %339  ;;  %2780 = vmatprep.mubr.msk.f32.mxu0 %vm3248_vm1, %v3246_v3 }
 0x2da   :  { %v444_v34 = vmul.f32 %v442_v31, %v3461_v17  ;;  %v342_v39 = vmul.f32 %v340_v32, %v3455_v14  ;;  %653 = vrot.lane.b32.xlu0 %v3478_v30, %s3249_s3  ;;  %v3541_v32 = vld [vmem:[%s4044_s1 + $0x30] sm:$0xff] }
 0x2db   :  { %2997 = vmatpush3.bf16.msra.mxu1 %v3406_v28 }
 0x2dc   :  { %v3486_v40 = vadd.f32 %v445_v26, %v444_v34  ;;  %453 = vst.msk [vmem:[#allocation3 + $0x38] sm:$0xff] %vm71_vm0, %v444_v34  ;;  %v3489_v41 = vadd.f32 %v342_v39, %v336_v19  ;;  %3004 = vmatprep.subr.bf16.mxu1 %v3247_v18  ;;  %v3546_v34 = vld [vmem:[%s4044_s1 + $0x8] sm:$0xff]  ;;  %v3549_v39 = vsub.f32 1.0, %v3541_v32 }
 0x2de   :  { %2770 = vmatmul.mubr.msk.f32.vlgmr.msra.gmra.mrb[10].mxu1 %vm71_vm0, %v3486_v40  ;;  %536 = vrot.lane.b32.xlu0 %v3489_v41, %s3249_s3 }
 0x2df   :  { %3006 = vmatpush3.bf16.msra.mxu1 %v3393_v25  ;;  %2791 = vmatprep.mubr.msk.f32.mxu1 %vm3248_vm1, %v3246_v3 }
 0x2e0   :  { %3007 = vmatprep.subr.bf16.mxu1 %v3247_v18 }
 0x2e3   :  { %3009 = vmatpush3.bf16.msra.mxu1 %v3406_v28 }
 0x2e4   :  { %3016 = vmatprep.subr.bf16.mxu1 %v3247_v18 }
 0x333   :  { %v174_v42 = vpop.f32.mrb[4].mxu0 }
 0x34c   :  { %v654_v2 = vpop.permute.xlu0 %653 }
 0x350   :  { %v537_v7 = vpop.permute.xlu0 %536 }
 0x3a9   :  { %v523_v46 = vpop.f32.mrb[8].mxu1 }
 0x3aa   :  { %v527_v47 = vadd.f32 %v523_v46, %v169_v44  ;;  %v2760_v48 = vpop.f32.mrb[9].mxu1  ;;  %v3551_v46 = vpop.f32.mrb[5].mxu0 }
 0x3ac   :  { %v2567_v56 = vmul.f32 -1.442695, %v527_v47 }
 0x3b1   :  { %v640_v50 = vpop.f32.mrb[10].mxu1 }
 0x3b2   :  { %v644_v51 = vadd.f32 %v640_v50, %v201_v49  ;;  %v2771_v52 = vpop.f32.mrb[11].mxu1  ;;  %v3557_v49 = vsub.f32 1.0, %v3546_v34  ;;  %v3559_v50 = vpop.f32.mrb[6].mxu0 }
 0x3b4   :  { %3132 = vtanh.f32 %v644_v51  ;;  %v2569_v55 = vmul.f32 -1.442695, %v644_v51  ;;  %v3561_v51 = vpop.f32.mrb[7].mxu0 }
 0x3b5   :  { %3134 = vtanh.f32 %v527_v47  ;;  %v678_v47 = vmul.f32 %v3486_v40, %v3549_v39  ;;  %v561_v40 = vmul.f32 %v3467_v24, %v3557_v49 }
 0x3b6   :  { %3136 = vpow2.f32 %v2569_v55 }
 0x3b7   :  { %3138 = vpow2.f32 %v2567_v56 }
 0x3be   :  { %v3133_v53 = vpop.eup %3132 }
 0x3bf   :  { %658 = vrot.lane.b32.xlu1 %v3133_v53, %s3249_s3  ;;  %v3135_v54 = vpop.eup %3134  ;;  %v3566_v53 = vpop.f32.mrb[8].mxu0 }
 0x3c0   :  { %v3137_v57 = vpop.eup %3136 }
 0x3c1   :  { %v648_v58 = vadd.f32 1.0, %v3137_v57  ;;  %v3139_v59 = vpop.eup %3138  ;;  %v685_v57 = vmul.f32 %v3478_v30, %v3549_v39 }
 0x3c2   :  { %v531_v60 = vadd.f32 1.0, %v3139_v59  ;;  %v3576_v59 = vpop.f32.mrb[9].mxu0 }
 0x3c3   :  { %541 = vrot.lane.b32.xlu1 %v3135_v54, %s3249_s3  ;;  %3140 = vrcp.f32 %v648_v58 }
 0x3c4   :  { %3142 = vrcp.f32 %v531_v60 }
 0x3cd   :  { %v3141_v35 = vpop.eup %3140 }
 0x3ce   :  { %v3143_v63 = vpop.eup %3142  ;;  %v656_v4 = vmul.f32 %v3141_v35, %v654_v2 }
 0x3cf   :  { %v539_v8 = vmul.f32 %v3143_v63, %v537_v7 }
 0x431   :  { %v659_v61 = vpop.permute.xlu1 %658 }
 0x432   :  { %v661_v62 = vmul.f32 %v3141_v35, %v659_v61 }
 0x434   :  { %663 = vrot.lane.b32.xlu1 %v661_v62, %s3249_s3 }
 0x435   :  { %v542_v0 = vpop.permute.xlu1 %541 }
 0x436   :  { %v544_v1 = vmul.f32 %v3143_v63, %v542_v0 }
 0x438   :  { %546 = vrot.lane.b32.xlu1 %v544_v1, %s3249_s3 }
 0x4a6   :  { %v664_v5 = vpop.permute.xlu1 %663 }
 0x4a7   :  { %v666_v6 = vadd.f32 %v664_v5, %v656_v4  ;;  %v175_v5 = vadd.f32 %v174_v42, %v3429_v37 }
 0x4a9   :  { %3144 = vtanh.f32 %v666_v6 }
 0x4aa   :  { %v547_v9 = vpop.permute.xlu1 %546 }
 0x4ab   :  { %v549_v10 = vadd.f32 %v547_v9, %v539_v8 }
 0x4ad   :  { %3146 = vtanh.f32 %v549_v10 }
 0x4b3   :  { %v3145_v12 = vpop.eup %3144 }
 0x4b4   :  { %669 = vrot.lane.b32.xlu0 %v3145_v12, %s3249_s3 }
 0x4b7   :  { %v3147_v19 = vpop.eup %3146 }
 0x4b8   :  { %552 = vrot.lane.b32.xlu1 %v3147_v19, %s3249_s3 }
 0x526   :  { %v670_v26 = vpop.permute.xlu0 %669 }
 0x527   :  { %v672_v27 = vmul.f32 %v3141_v35, %v670_v26  ;;  %v568_v35 = vmul.f32 %v3489_v41, %v3557_v49  ;;  %v3606_v41 = vpop.f32.mrb[10].mxu0 }
 0x529   :  { %674 = vrot.lane.b32.xlu0 %v672_v27, %s3250_s2 }
 0x52a   :  { %v553_v29 = vpop.permute.xlu1 %552 }
 0x52b   :  { %v555_v31 = vmul.f32 %v3143_v63, %v553_v29  ;;  %v194_v63 = vpop.f32.mrb[11].mxu0 }
 0x52c   :  { %v195_v0 = vadd.f32 %v194_v63, %v3434_v45 }
 0x52d   :  { %557 = vrot.lane.b32.xlu1 %v555_v31, %s3250_s2  ;;  %681 = vrot.lane.b32.xlu0 %v666_v6, %s3251_s30 }
 0x531   :  { %564 = vrot.lane.b32.xlu0 %v549_v10, %s3251_s30 }
 0x59b   :  { %v675_v44 = vpop.permute.xlu0 %674 }
 0x59c   :  { %v677_v48 = vmul.f32 %v675_v44, %v3541_v32 }
 0x59e   :  { %v3563_v52 = vadd.f32 %v678_v47, %v677_v48  ;;  %687 = vst.msk [vmem:[#allocation3 + $0x30] sm:$0xff] %vm71_vm0, %v677_v48 }
 0x59f   :  { %v558_v54 = vpop.permute.xlu1 %557  ;;  %v682_v55 = vpop.permute.xlu0 %681 }
 0x5a0   :  { %v560_v56 = vmul.f32 %v558_v54, %v3546_v34  ;;  %v684_v58 = vmul.f32 %v682_v55, %v3541_v32  ;;  %2792 = vmatmul.mubr.msk.f32.vlgmr.msra.gmra.mrb[12].mxu1 %vm71_vm0, %v3563_v52 }
 0x5a1   :  { %3018 = vmatpush3.bf16.msra.mxu1 %v3393_v25  ;;  %2813 = vmatprep.mubr.msk.f32.mxu1 %vm3248_vm1, %v3246_v3 }
 0x5a2   :  { %v3581_v60 = vadd.f32 %v561_v40, %v560_v56  ;;  %570 = vst.msk [vmem:[#allocation2 + $0x8] sm:$0xff] %vm71_vm0, %v560_v56  ;;  %v3584_v24 = vadd.f32 %v685_v57, %v684_v58  ;;  %3019 = vmatprep.subr.bf16.mxu1 %v3247_v18 }
 0x5a3   :  { %v565_v30 = vpop.permute.xlu0 %564 }
 0x5a4   :  { %v567_v61 = vmul.f32 %v565_v30, %v3546_v34  ;;  %2781 = vmatmul.mubr.msk.f32.vlgmr.msra.gmra.mrb[12].mxu0 %vm71_vm0, %v3581_v60  ;;  %887 = vrot.lane.b32.xlu0 %v3584_v24, %s3249_s3 }
 0x5a5   :  { %3012 = vmatpush3.bf16.msra.mxu0 %v3357_v16  ;;  %3021 = vmatpush3.bf16.msra.mxu1 %v3406_v28 }
 0x5a6   :  { %v3596_v62 = vadd.f32 %v568_v35, %v567_v61  ;;  %3013 = vmatprep.subr.bf16.mxu0 %v3247_v18  ;;  %2802 = vmatprep.mubr.msk.f32.mxu0 %vm3248_vm1, %v3246_v3 }
 0x5a7   :  { %3028 = vmatprep.subr.bf16.mxu1 %v3247_v18 }
 0x5a8   :  { %770 = vrot.lane.b32.xlu0 %v3596_v62, %s3249_s3 }
 0x5a9   :  { %3015 = vmatpush3.bf16.msra.mxu0 %v3377_v22 }
 0x5aa   :  { %3022 = vmatprep.subr.bf16.mxu0 %v3247_v18 }
 0x616   :  { %v888_v47 = vpop.permute.xlu0 %887 }
 0x61a   :  { %v771_v40 = vpop.permute.xlu0 %770 }
 0x673   :  { %v874_v1 = vpop.f32.mrb[12].mxu1 }
 0x674   :  { %v878_v2 = vadd.f32 %v874_v1, %v195_v0  ;;  %v2793_v4 = vpop.f32.mrb[13].mxu1 }
 0x676   :  { %3148 = vtanh.f32 %v878_v2  ;;  %v2573_v11 = vmul.f32 -1.442695, %v878_v2  ;;  %v3623_v2 = vld [vmem:[%s4044_s1 + $0x28] sm:$0xff] }
 0x677   :  { %v757_v6 = vpop.f32.mrb[12].mxu0  ;;  %v3626_v4 = vsub.f32 1.0, %v3623_v2 }
 0x678   :  { %v761_v7 = vadd.f32 %v757_v6, %v175_v5  ;;  %v2782_v8 = vpop.f32.mrb[13].mxu0  ;;  %v3631_v5 = vld [vmem:[%s4044_s1 + $0x10] sm:$0xff] }
 0x67a   :  { %3150 = vtanh.f32 %v761_v7  ;;  %v2571_v12 = vmul.f32 -1.442695, %v761_v7  ;;  %v912_v7 = vmul.f32 %v3563_v52, %v3626_v4 }
 0x67b   :  { %3152 = vpow2.f32 %v2573_v11 }
 0x67c   :  { %3154 = vpow2.f32 %v2571_v12 }
 0x680   :  { %v3149_v9 = vpop.eup %3148 }
 0x681   :  { %892 = vrot.lane.b32.xlu1 %v3149_v9, %s3249_s3  ;;  %v3637_v9 = vsub.f32 1.0, %v3631_v5 }
 0x684   :  { %v3151_v10 = vpop.eup %3150 }
 0x685   :  { %775 = vrot.lane.b32.xlu1 %v3151_v10, %s3249_s3  ;;  %v3153_v13 = vpop.eup %3152 }
 0x686   :  { %v882_v19 = vadd.f32 1.0, %v3153_v13  ;;  %v3155_v21 = vpop.eup %3154  ;;  %v795_v13 = vmul.f32 %v3581_v60, %v3637_v9 }
 0x687   :  { %v765_v23 = vadd.f32 1.0, %v3155_v21  ;;  %v919_v21 = vmul.f32 %v3584_v24, %v3626_v4  ;;  %v802_v24 = vmul.f32 %v3596_v62, %v3637_v9  ;;  %v189_v62 = vadd.f32 %v3576_v59, %v3434_v45 }
 0x688   :  { %3156 = vrcp.f32 %v882_v19 }
 0x689   :  { %3158 = vrcp.f32 %v765_v23 }
 0x692   :  { %v3157_v26 = vpop.eup %3156 }
 0x693   :  { %v3159_v31 = vpop.eup %3158  ;;  %v890_v48 = vmul.f32 %v3157_v26, %v888_v47  ;;  %v181_v47 = vadd.f32 %v3559_v50, %v3429_v37 }
 0x694   :  { %v773_v56 = vmul.f32 %v3159_v31, %v771_v40 }
 0x6f3   :  { %v893_v27 = vpop.permute.xlu1 %892 }
 0x6f4   :  { %v895_v29 = vmul.f32 %v3157_v26, %v893_v27 }
 0x6f6   :  { %897 = vrot.lane.b32.xlu1 %v895_v29, %s3249_s3 }
 0x6f7   :  { %v776_v42 = vpop.permute.xlu1 %775 }
 0x6f8   :  { %v778_v44 = vmul.f32 %v3159_v31, %v776_v42 }
 0x6fa   :  { %780 = vrot.lane.b32.xlu1 %v778_v44, %s3249_s3 }
 0x768   :  { %v898_v54 = vpop.permute.xlu1 %897 }
 0x769   :  { %v900_v55 = vadd.f32 %v898_v54, %v890_v48 }
 0x76b   :  { %3160 = vtanh.f32 %v900_v55 }
 0x76c   :  { %v781_v57 = vpop.permute.xlu1 %780 }
 0x76d   :  { %v783_v58 = vadd.f32 %v781_v57, %v773_v56 }
 0x76f   :  { %3162 = vtanh.f32 %v783_v58 }
 0x775   :  { %v3161_v30 = vpop.eup %3160 }
 0x776   :  { %903 = vrot.lane.b32.xlu0 %v3161_v30, %s3249_s3 }
 0x779   :  { %v3163_v35 = vpop.eup %3162 }
 0x77a   :  { %786 = vrot.lane.b32.xlu1 %v3163_v35, %s3249_s3 }
 0x7e8   :  { %v904_v61 = vpop.permute.xlu0 %903 }
 0x7e9   :  { %v906_v63 = vmul.f32 %v3157_v26, %v904_v61 }
 0x7eb   :  { %908 = vrot.lane.b32.xlu0 %v906_v63, %s3250_s2 }
 0x7ec   :  { %v787_v0 = vpop.permute.xlu1 %786 }
 0x7ed   :  { %v789_v1 = vmul.f32 %v3159_v31, %v787_v0 }
 0x7ef   :  { %791 = vrot.lane.b32.xlu1 %v789_v1, %s3250_s2  ;;  %915 = vrot.lane.b32.xlu0 %v900_v55, %s3251_s30 }
 0x7f3   :  { %798 = vrot.lane.b32.xlu0 %v783_v58, %s3251_s30 }
 0x85d   :  { %v909_v6 = vpop.permute.xlu0 %908 }
 0x85e   :  { %v911_v8 = vmul.f32 %v909_v6, %v3623_v2 }
 0x860   :  { %v3639_v10 = vadd.f32 %v912_v7, %v911_v8  ;;  %921 = vst.msk [vmem:[#allocation3 + $0x28] sm:$0xff] %vm71_vm0, %v911_v8 }
 0x861   :  { %v792_v11 = vpop.permute.xlu1 %791  ;;  %v916_v12 = vpop.permute.xlu0 %915 }
 0x862   :  { %v794_v19 = vmul.f32 %v792_v11, %v3631_v5  ;;  %v918_v52 = vmul.f32 %v916_v12, %v3623_v2  ;;  %2814 = vmatmul.mubr.msk.f32.vlgmr.msra.gmra.mrb[14].mxu1 %vm71_vm0, %v3639_v10 }
 0x863   :  { %3030 = vmatpush3.bf16.msra.mxu1 %v3393_v25  ;;  %2835 = vmatprep.mubr.msk.f32.mxu1 %vm3248_vm1, %v3246_v3 }
 0x864   :  { %v3653_v23 = vadd.f32 %v795_v13, %v794_v19  ;;  %804 = vst.msk [vmem:[#allocation2 + $0x10] sm:$0xff] %vm71_vm0, %v794_v19  ;;  %v3656_v60 = vadd.f32 %v919_v21, %v918_v52  ;;  %3031 = vmatprep.subr.bf16.mxu1 %v3247_v18 }
 0x865   :  { %v799_v26 = vpop.permute.xlu0 %798 }
 0x866   :  { %v801_v27 = vmul.f32 %v799_v26, %v3631_v5  ;;  %2803 = vmatmul.mubr.msk.f32.vlgmr.msra.gmra.mrb[14].mxu0 %vm71_vm0, %v3653_v23  ;;  %1121 = vrot.lane.b32.xlu0 %v3656_v60, %s3249_s3 }
 0x867   :  { %3024 = vmatpush3.bf16.msra.mxu0 %v3357_v16  ;;  %3033 = vmatpush3.bf16.msra.mxu1 %v3406_v28 }
 0x868   :  { %v3668_v29 = vadd.f32 %v802_v24, %v801_v27  ;;  %3025 = vmatprep.subr.bf16.mxu0 %v3247_v18  ;;  %2824 = vmatprep.mubr.msk.f32.mxu0 %vm3248_vm1, %v3246_v3 }
 0x869   :  { %3040 = vmatprep.subr.bf16.mxu1 %v3247_v18 }
 0x86a   :  { %1004 = vrot.lane.b32.xlu0 %v3668_v29, %s3249_s3 }
 0x86b   :  { %3027 = vmatpush3.bf16.msra.mxu0 %v3377_v22 }
 0x86c   :  { %3034 = vmatprep.subr.bf16.mxu0 %v3247_v18 }
 0x8d8   :  { %v1122_v8 = vpop.permute.xlu0 %1121 }
 0x8dc   :  { %v1005_v19 = vpop.permute.xlu0 %1004 }
 0x935   :  { %v1108_v31 = vpop.f32.mrb[14].mxu1 }
 0x936   :  { %v1112_v42 = vadd.f32 %v1108_v31, %v189_v62  ;;  %v2815_v44 = vpop.f32.mrb[15].mxu1 }
 0x938   :  { %3164 = vtanh.f32 %v1112_v42  ;;  %v2577_v57 = vmul.f32 -1.442695, %v1112_v42 }
 0x939   :  { %v991_v48 = vpop.f32.mrb[14].mxu0 }
 0x93a   :  { %v995_v54 = vadd.f32 %v991_v48, %v181_v47  ;;  %v2804_v55 = vpop.f32.mrb[15].mxu0  ;;  %v3695_v47 = vld [vmem:[%s4044_s1 + $0x20] sm:$0xff] }
 0x93b   :  { %v3698_v48 = vsub.f32 1.0, %v3695_v47 }
 0x93c   :  { %3166 = vtanh.f32 %v995_v54  ;;  %v2575_v59 = vmul.f32 -1.442695, %v995_v54  ;;  %v3703_v54 = vld [vmem:[%s4044_s1 + $0x18] sm:$0xff] }
 0x93d   :  { %3168 = vpow2.f32 %v2577_v57  ;;  %v3709_v57 = vsub.f32 1.0, %v3703_v54 }
 0x93e   :  { %3170 = vpow2.f32 %v2575_v59 }
 0x942   :  { %v3165_v40 = vpop.eup %3164 }
 0x943   :  { %1126 = vrot.lane.b32.xlu1 %v3165_v40, %s3249_s3  ;;  %v1146_v40 = vmul.f32 %v3639_v10, %v3698_v48 }
 0x946   :  { %v3167_v56 = vpop.eup %3166 }
 0x947   :  { %1009 = vrot.lane.b32.xlu1 %v3167_v56, %s3249_s3  ;;  %v3169_v58 = vpop.eup %3168 }
 0x948   :  { %v1116_v30 = vadd.f32 1.0, %v3169_v58  ;;  %v3171_v35 = vpop.eup %3170 }
 0x949   :  { %v999_v50 = vadd.f32 1.0, %v3171_v35  ;;  %v1029_v35 = vmul.f32 %v3653_v23, %v3709_v57 }
 0x94a   :  { %3172 = vrcp.f32 %v1116_v30 }
 0x94b   :  { %3174 = vrcp.f32 %v999_v50 }
 0x954   :  { %v3173_v61 = vpop.eup %3172 }
 0x955   :  { %v3175_v1 = vpop.eup %3174  ;;  %v1124_v11 = vmul.f32 %v3173_v61, %v1122_v8 }
 0x956   :  { %v1007_v21 = vmul.f32 %v3175_v1, %v1005_v19 }
 0x9b5   :  { %v1127_v63 = vpop.permute.xlu1 %1126 }
 0x9b6   :  { %v1129_v0 = vmul.f32 %v3173_v61, %v1127_v63 }
 0x9b8   :  { %1131 = vrot.lane.b32.xlu1 %v1129_v0, %s3249_s3 }
 0x9b9   :  { %v1010_v6 = vpop.permute.xlu1 %1009 }
 0x9ba   :  { %v1012_v7 = vmul.f32 %v3175_v1, %v1010_v6 }
 0x9bc   :  { %1014 = vrot.lane.b32.xlu1 %v1012_v7, %s3249_s3 }
 0xa2a   :  { %v1132_v12 = vpop.permute.xlu1 %1131 }
 0xa2b   :  { %v1134_v13 = vadd.f32 %v1132_v12, %v1124_v11  ;;  %v187_v12 = vadd.f32 %v3566_v53, %v3429_v37 }
 0xa2d   :  { %3176 = vtanh.f32 %v1134_v13 }
 0xa2e   :  { %v1015_v52 = vpop.permute.xlu1 %1014 }
 0xa2f   :  { %v1017_v26 = vadd.f32 %v1015_v52, %v1007_v21 }
 0xa31   :  { %3178 = vtanh.f32 %v1017_v26 }
 0xa37   :  { %v3177_v24 = vpop.eup %3176 }
 0xa38   :  { %1137 = vrot.lane.b32.xlu0 %v3177_v24, %s3249_s3 }
 0xa3b   :  { %v3179_v27 = vpop.eup %3178 }
 0xa3c   :  { %1020 = vrot.lane.b32.xlu1 %v3179_v27, %s3249_s3 }
 0xaaa   :  { %v1138_v62 = vpop.permute.xlu0 %1137 }
 0xaab   :  { %v1140_v31 = vmul.f32 %v3173_v61, %v1138_v62  ;;  %v1153_v61 = vmul.f32 %v3656_v60, %v3698_v48  ;;  %v1036_v60 = vmul.f32 %v3668_v29, %v3709_v57  ;;  %v183_v29 = vadd.f32 %v3561_v51, %v3434_v45 }
 0xaad   :  { %1142 = vrot.lane.b32.xlu0 %v1140_v31, %s3250_s2 }
 0xaae   :  { %v1021_v42 = vpop.permute.xlu1 %1020 }
 0xaaf   :  { %v1023_v44 = vmul.f32 %v3175_v1, %v1021_v42 }
 0xab1   :  { %1025 = vrot.lane.b32.xlu1 %v1023_v44, %s3250_s2  ;;  %1149 = vrot.lane.b32.xlu0 %v1134_v13, %s3251_s30 }
 0xab5   :  { %1032 = vrot.lane.b32.xlu0 %v1017_v26, %s3251_s30 }
 0xb1f   :  { %v1143_v55 = vpop.permute.xlu0 %1142 }
 0xb20   :  { %v1145_v56 = vmul.f32 %v1143_v55, %v3695_v47 }
 0xb22   :  { %v3711_v59 = vadd.f32 %v1146_v40, %v1145_v56  ;;  %1155 = vst.msk [vmem:[#allocation3 + $0x20] sm:$0xff] %vm71_vm0, %v1145_v56 }
 0xb23   :  { %v1026_v58 = vpop.permute.xlu1 %1025  ;;  %v1150_v30 = vpop.permute.xlu0 %1149 }
 0xb24   :  { %v1028_v50 = vmul.f32 %v1026_v58, %v3703_v54  ;;  %v1152_v10 = vmul.f32 %v1150_v30, %v3695_v47  ;;  %2836 = vmatmul.mubr.msk.f32.vlgmr.msra.gmra.mrb[16].mxu1 %vm71_vm0, %v3711_v59 }
 0xb25   :  { %3042 = vmatpush3.bf16.msra.mxu1 %v3393_v25  ;;  %2857 = vmatprep.mubr.msk.f32.mxu1 %vm3248_vm1, %v3246_v3 }
 0xb26   :  { %v3725_v63 = vadd.f32 %v1029_v35, %v1028_v50  ;;  %1038 = vst.msk [vmem:[#allocation2 + $0x18] sm:$0xff] %vm71_vm0, %v1028_v50  ;;  %v3728_v23 = vadd.f32 %v1153_v61, %v1152_v10  ;;  %3043 = vmatprep.subr.bf16.mxu1 %v3247_v18 }
 0xb27   :  { %v1033_v0 = vpop.permute.xlu0 %1032 }
 0xb28   :  { %v1035_v1 = vmul.f32 %v1033_v0, %v3703_v54  ;;  %2825 = vmatmul.mubr.msk.f32.vlgmr.msra.gmra.mrb[16].mxu0 %vm71_vm0, %v3725_v63  ;;  %1355 = vrot.lane.b32.xlu0 %v3728_v23, %s3249_s3 }
 0xb29   :  { %3036 = vmatpush3.bf16.msra.mxu0 %v3357_v16  ;;  %3045 = vmatpush3.bf16.msra.mxu1 %v3406_v28  ;;  %v2094_v17 = vld [vmem:[#allocation3 + $0x20] sm:$0xff] }
 0xb2a   :  { %v3740_v6 = vadd.f32 %v1036_v60, %v1035_v1  ;;  %3037 = vmatprep.subr.bf16.mxu0 %v3247_v18  ;;  %2846 = vmatprep.mubr.msk.f32.mxu0 %vm3248_vm1, %v3246_v3 }
 0xb2b   :  { %3052 = vmatprep.subr.bf16.mxu1 %v3247_v18 }
 0xb2c   :  { %1238 = vrot.lane.b32.xlu0 %v3740_v6, %s3249_s3 }
 0xb2d   :  { %3039 = vmatpush3.bf16.msra.mxu0 %v3377_v22 }
 0xb2e   :  { %3046 = vmatprep.subr.bf16.mxu0 %v3247_v18 }
 0xb9a   :  { %v1356_v30 = vpop.permute.xlu0 %1355 }
 0xb9e   :  { %v1239_v10 = vpop.permute.xlu0 %1238 }
 0xbf7   :  { %v1342_v7 = vpop.f32.mrb[16].mxu1 }
 0xbf8   :  { %v1346_v8 = vadd.f32 %v1342_v7, %v183_v29  ;;  %v2837_v11 = vpop.f32.mrb[17].mxu1 }
 0xbfa   :  { %3180 = vtanh.f32 %v1346_v8  ;;  %v2581_v24 = vmul.f32 -1.442695, %v1346_v8 }
 0xbfb   :  { %v1225_v13 = vpop.f32.mrb[16].mxu0 }
 0xbfc   :  { %v1229_v19 = vadd.f32 %v1225_v13, %v187_v12  ;;  %v2826_v21 = vpop.f32.mrb[17].mxu0 }
 0xbfd   :  { %v1380_v21 = vmul.f32 %v3711_v59, %v3709_v57 }
 0xbfe   :  { %3182 = vtanh.f32 %v1229_v19  ;;  %v2579_v51 = vmul.f32 -1.442695, %v1229_v19 }
 0xbff   :  { %3184 = vpow2.f32 %v2581_v24 }
 0xc00   :  { %3186 = vpow2.f32 %v2579_v51 }
 0xc04   :  { %v3181_v52 = vpop.eup %3180 }
 0xc05   :  { %1360 = vrot.lane.b32.xlu1 %v3181_v52, %s3249_s3 }
 0xc08   :  { %v3183_v26 = vpop.eup %3182 }
 0xc09   :  { %1243 = vrot.lane.b32.xlu1 %v3183_v26, %s3249_s3  ;;  %v3185_v27 = vpop.eup %3184 }
 0xc0a   :  { %v1350_v62 = vadd.f32 1.0, %v3185_v27  ;;  %v3187_v31 = vpop.eup %3186  ;;  %v1263_v27 = vmul.f32 %v3725_v63, %v3698_v48 }
 0xc0b   :  { %v1233_v53 = vadd.f32 1.0, %v3187_v31  ;;  %v1387_v31 = vmul.f32 %v3728_v23, %v3709_v57 }
 0xc0c   :  { %3188 = vrcp.f32 %v1350_v62 }
 0xc0d   :  { %3190 = vrcp.f32 %v1233_v53 }
 0xc16   :  { %v3189_v42 = vpop.eup %3188 }
 0xc17   :  { %v3191_v40 = vpop.eup %3190  ;;  %v1358_v35 = vmul.f32 %v3189_v42, %v1356_v30 }
 0xc18   :  { %v1241_v0 = vmul.f32 %v3191_v40, %v1239_v10 }
 0xc77   :  { %v1361_v44 = vpop.permute.xlu1 %1360 }
 0xc78   :  { %v1363_v55 = vmul.f32 %v3189_v42, %v1361_v44 }
 0xc7a   :  { %1365 = vrot.lane.b32.xlu1 %v1363_v55, %s3249_s3  ;;  %v193_v55 = vadd.f32 %v3606_v41, %v3429_v37 }
 0xc7b   :  { %v1244_v56 = vpop.permute.xlu1 %1243 }
 0xc7c   :  { %v1246_v58 = vmul.f32 %v3191_v40, %v1244_v56 }
 0xc7e   :  { %1248 = vrot.lane.b32.xlu1 %v1246_v58, %s3249_s3 }
 0xcec   :  { %v1366_v50 = vpop.permute.xlu1 %1365 }
 0xced   :  { %v1368_v61 = vadd.f32 %v1366_v50, %v1358_v35 }
 0xcef   :  { %3192 = vtanh.f32 %v1368_v61 }
 0xcf0   :  { %v1249_v60 = vpop.permute.xlu1 %1248 }
 0xcf1   :  { %v1251_v1 = vadd.f32 %v1249_v60, %v1241_v0 }
 0xcf3   :  { %3194 = vtanh.f32 %v1251_v1 }
 0xcf9   :  { %v3193_v29 = vpop.eup %3192 }
 0xcfa   :  { %1371 = vrot.lane.b32.xlu0 %v3193_v29, %s3249_s3 }
 0xcfd   :  { %v3195_v7 = vpop.eup %3194 }
 0xcfe   :  { %1254 = vrot.lane.b32.xlu1 %v3195_v7, %s3249_s3 }
 0xd6c   :  { %v1372_v8 = vpop.permute.xlu0 %1371 }
 0xd6d   :  { %v1374_v11 = vmul.f32 %v3189_v42, %v1372_v8 }
 0xd6f   :  { %1376 = vrot.lane.b32.xlu0 %v1374_v11, %s3250_s2 }
 0xd70   :  { %v1255_v12 = vpop.permute.xlu1 %1254 }
 0xd71   :  { %v1257_v13 = vmul.f32 %v3191_v40, %v1255_v12 }
 0xd73   :  { %1259 = vrot.lane.b32.xlu1 %v1257_v13, %s3250_s2  ;;  %1383 = vrot.lane.b32.xlu0 %v1368_v61, %s3251_s30 }
 0xd77   :  { %1266 = vrot.lane.b32.xlu0 %v1251_v1, %s3251_s30 }
 0xde1   :  { %v1377_v19 = vpop.permute.xlu0 %1376 }
 0xde2   :  { %v1379_v52 = vmul.f32 %v1377_v19, %v3703_v54 }
 0xde4   :  { %v3767_v26 = vadd.f32 %v1380_v21, %v1379_v52  ;;  %1389 = vst.msk [vmem:[#allocation3 + $0x18] sm:$0xff] %vm71_vm0, %v1379_v52 }
 0xde5   :  { %v1260_v24 = vpop.permute.xlu1 %1259  ;;  %v1384_v51 = vpop.permute.xlu0 %1383 }
 0xde6   :  { %v1262_v62 = vmul.f32 %v1260_v24, %v3695_v47  ;;  %v1386_v53 = vmul.f32 %v1384_v51, %v3703_v54  ;;  %2858 = vmatmul.mubr.msk.f32.vlgmr.msra.gmra.mrb[18].mxu1 %vm71_vm0, %v3767_v26  ;;  %v1270_v54 = vmul.f32 %v3740_v6, %v3698_v48 }
 0xde7   :  { %3054 = vmatpush3.bf16.msra.mxu1 %v3393_v25  ;;  %2879 = vmatprep.mubr.msk.f32.mxu1 %vm3248_vm1, %v3246_v3 }
 0xde8   :  { %v3781_v59 = vadd.f32 %v1263_v27, %v1262_v62  ;;  %1272 = vst.msk [vmem:[#allocation2 + $0x20] sm:$0xff] %vm71_vm0, %v1262_v62  ;;  %v3784_v63 = vadd.f32 %v1387_v31, %v1386_v53  ;;  %3055 = vmatprep.subr.bf16.mxu1 %v3247_v18 }
 0xde9   :  { %v1267_v42 = vpop.permute.xlu0 %1266 }
 0xdea   :  { %v1269_v57 = vmul.f32 %v1267_v42, %v3695_v47  ;;  %2847 = vmatmul.mubr.msk.f32.vlgmr.msra.gmra.mrb[18].mxu0 %vm71_vm0, %v3781_v59  ;;  %1589 = vrot.lane.b32.xlu0 %v3784_v63, %s3249_s3  ;;  %v177_v47 = vadd.f32 %v3551_v46, %v3434_v45 }
 0xdeb   :  { %3048 = vmatpush3.bf16.msra.mxu0 %v3357_v16  ;;  %3057 = vmatpush3.bf16.msra.mxu1 %v3406_v28 }
 0xdec   :  { %v3796_v23 = vadd.f32 %v1270_v54, %v1269_v57  ;;  %3049 = vmatprep.subr.bf16.mxu0 %v3247_v18  ;;  %2868 = vmatprep.mubr.msk.f32.mxu0 %vm3248_vm1, %v3246_v3 }
 0xded   :  { %3064 = vmatprep.subr.bf16.mxu1 %v3247_v18 }
 0xdee   :  { %1472 = vrot.lane.b32.xlu0 %v3796_v23, %s3249_s3 }
 0xdef   :  { %3051 = vmatpush3.bf16.msra.mxu0 %v3377_v22 }
 0xdf0   :  { %3058 = vmatprep.subr.bf16.mxu0 %v3247_v18 }
 0xe5c   :  { %v1590_v12 = vpop.permute.xlu0 %1589 }
 0xe60   :  { %v1473_v52 = vpop.permute.xlu0 %1472 }
 0xeb9   :  { %v1576_v48 = vpop.f32.mrb[18].mxu1 }
 0xeba   :  { %v1580_v6 = vadd.f32 %v1576_v48, %v177_v47  ;;  %v2859_v44 = vpop.f32.mrb[19].mxu1  ;;  %v1614_v48 = vmul.f32 %v3767_v26, %v3637_v9 }
 0xebc   :  { %3196 = vtanh.f32 %v1580_v6  ;;  %v2585_v50 = vmul.f32 -1.442695, %v1580_v6 }
 0xebd   :  { %v1459_v40 = vpop.f32.mrb[18].mxu0 }
 0xebe   :  { %v1463_v56 = vadd.f32 %v1459_v40, %v193_v55  ;;  %v2848_v58 = vpop.f32.mrb[19].mxu0 }
 0xec0   :  { %3198 = vtanh.f32 %v1463_v56  ;;  %v2583_v46 = vmul.f32 -1.442695, %v1463_v56  ;;  %v1497_v56 = vmul.f32 %v3781_v59, %v3626_v4 }
 0xec1   :  { %3200 = vpow2.f32 %v2585_v50 }
 0xec2   :  { %3202 = vpow2.f32 %v2583_v46 }
 0xec6   :  { %v3197_v30 = vpop.eup %3196 }
 0xec7   :  { %1594 = vrot.lane.b32.xlu1 %v3197_v30, %s3249_s3  ;;  %v1621_v30 = vmul.f32 %v3784_v63, %v3637_v9  ;;  %v199_v63 = vadd.f32 %v3423_v33, %v3429_v37 }
 0xeca   :  { %v3199_v35 = vpop.eup %3198 }
 0xecb   :  { %1477 = vrot.lane.b32.xlu1 %v3199_v35, %s3249_s3  ;;  %v3201_v61 = vpop.eup %3200 }
 0xecc   :  { %v1584_v10 = vadd.f32 1.0, %v3201_v61  ;;  %v3203_v0 = vpop.eup %3202 }
 0xecd   :  { %v1467_v41 = vadd.f32 1.0, %v3203_v0 }
 0xece   :  { %3204 = vrcp.f32 %v1584_v10 }
 0xecf   :  { %3206 = vrcp.f32 %v1467_v41 }
 0xed8   :  { %v3205_v60 = vpop.eup %3204 }
 0xed9   :  { %v3207_v7 = vpop.eup %3206  ;;  %v1592_v13 = vmul.f32 %v3205_v60, %v1590_v12 }
 0xeda   :  { %v1475_v24 = vmul.f32 %v3207_v7, %v1473_v52 }
 0xf39   :  { %v1595_v1 = vpop.permute.xlu1 %1594 }
 0xf3a   :  { %v1597_v29 = vmul.f32 %v3205_v60, %v1595_v1 }
 0xf3c   :  { %1599 = vrot.lane.b32.xlu1 %v1597_v29, %s3249_s3 }
 0xf3d   :  { %v1478_v8 = vpop.permute.xlu1 %1477 }
 0xf3e   :  { %v1480_v11 = vmul.f32 %v3207_v7, %v1478_v8 }
 0xf40   :  { %1482 = vrot.lane.b32.xlu1 %v1480_v11, %s3249_s3 }
 0xfae   :  { %v1600_v19 = vpop.permute.xlu1 %1599 }
 0xfaf   :  { %v1602_v21 = vadd.f32 %v1600_v19, %v1592_v13 }
 0xfb1   :  { %3208 = vtanh.f32 %v1602_v21 }
 0xfb2   :  { %v1483_v51 = vpop.permute.xlu1 %1482 }
 0xfb3   :  { %v1485_v27 = vadd.f32 %v1483_v51, %v1475_v24 }
 0xfb5   :  { %3210 = vtanh.f32 %v1485_v27 }
 0xfbb   :  { %v3209_v62 = vpop.eup %3208 }
 0xfbc   :  { %1605 = vrot.lane.b32.xlu0 %v3209_v62, %s3249_s3 }
 0xfbf   :  { %v3211_v31 = vpop.eup %3210 }
 0xfc0   :  { %1488 = vrot.lane.b32.xlu1 %v3211_v31, %s3249_s3 }
0x102e   :  { %v1606_v53 = vpop.permute.xlu0 %1605 }
0x102f   :  { %v1608_v42 = vmul.f32 %v3205_v60, %v1606_v53 }
0x1031   :  { %1610 = vrot.lane.b32.xlu0 %v1608_v42, %s3250_s2 }
0x1032   :  { %v1489_v54 = vpop.permute.xlu1 %1488 }
0x1033   :  { %v1491_v57 = vmul.f32 %v3207_v7, %v1489_v54 }
0x1035   :  { %1493 = vrot.lane.b32.xlu1 %v1491_v57, %s3250_s2  ;;  %1617 = vrot.lane.b32.xlu0 %v1602_v21, %s3251_s30 }
0x1039   :  { %1500 = vrot.lane.b32.xlu0 %v1485_v27, %s3251_s30 }
0x10a3   :  { %v1611_v47 = vpop.permute.xlu0 %1610 }
0x10a4   :  { %v1613_v6 = vmul.f32 %v1611_v47, %v3631_v5 }
0x10a6   :  { %v3823_v44 = vadd.f32 %v1614_v48, %v1613_v6  ;;  %1623 = vst.msk [vmem:[#allocation3 + $0x10] sm:$0xff] %vm71_vm0, %v1613_v6 }
0x10a7   :  { %v1494_v55 = vpop.permute.xlu1 %1493  ;;  %v1618_v40 = vpop.permute.xlu0 %1617 }
0x10a8   :  { %v1496_v58 = vmul.f32 %v1494_v55, %v3623_v2  ;;  %v1620_v35 = vmul.f32 %v1618_v40, %v3631_v5  ;;  %2880 = vmatmul.mubr.msk.f32.vlgmr.msra.gmra.mrb[20].mxu1 %vm71_vm0, %v3823_v44  ;;  %v1504_v5 = vmul.f32 %v3796_v23, %v3626_v4  ;;  %v1848_v55 = vmul.f32 %v3823_v44, %v3557_v49 }
0x10a9   :  { %3066 = vmatpush3.bf16.msra.mxu1 %v3393_v25  ;;  %2901 = vmatprep.mubr.msk.f32.mxu1 %vm3248_vm1, %v3246_v3 }
0x10aa   :  { %v3837_v26 = vadd.f32 %v1497_v56, %v1496_v58  ;;  %1506 = vst.msk [vmem:[#allocation2 + $0x28] sm:$0xff] %vm71_vm0, %v1496_v58  ;;  %v3840_v59 = vadd.f32 %v1621_v30, %v1620_v35  ;;  %3067 = vmatprep.subr.bf16.mxu1 %v3247_v18 }
0x10ab   :  { %v1501_v50 = vpop.permute.xlu0 %1500 }
0x10ac   :  { %v1503_v9 = vmul.f32 %v1501_v50, %v3623_v2  ;;  %2869 = vmatmul.mubr.msk.f32.vlgmr.msra.gmra.mrb[20].mxu0 %vm71_vm0, %v3837_v26  ;;  %1823 = vrot.lane.b32.xlu0 %v3840_v59, %s3249_s3  ;;  %v171_v2 = vadd.f32 %v3502_v43, %v3434_v45  ;;  %v1731_v35 = vmul.f32 %v3837_v26, %v3549_v39 }
0x10ad   :  { %3060 = vmatpush3.bf16.msra.mxu0 %v3357_v16  ;;  %3069 = vmatpush3.bf16.msra.mxu1 %v3406_v28 }
0x10ae   :  { %v3852_v25 = vadd.f32 %v1504_v5, %v1503_v9  ;;  %3061 = vmatprep.subr.bf16.mxu0 %v3247_v18  ;;  %2890 = vmatprep.mubr.msk.f32.mxu0 %vm3248_vm1, %v3246_v3  ;;  %v1855_v5 = vmul.f32 %v3840_v59, %v3557_v49  ;;  %v165_v49 = vadd.f32 %v3427_v36, %v3434_v45 }
0x10af   :  { %3086 = vmatprep.subr.bf16.mxu1 %v3247_v18 }
0x10b0   :  { %1706 = vrot.lane.b32.xlu0 %v3852_v25, %s3249_s3  ;;  %v1738_v26 = vmul.f32 %v3852_v25, %v3549_v39 }
0x10b1   :  { %3063 = vmatpush3.bf16.msra.mxu0 %v3377_v22 }
0x111e   :  { %v1824_v19 = vpop.permute.xlu0 %1823 }
0x1122   :  { %v1707_v51 = vpop.permute.xlu0 %1706 }
0x117b   :  { %v1810_v16 = vpop.f32.mrb[20].mxu1 }
0x117c   :  { %v1814_v4 = vadd.f32 %v1810_v16, %v171_v2  ;;  %v2881_v28 = vpop.f32.mrb[21].mxu1 }
0x117e   :  { %3212 = vtanh.f32 %v1814_v4  ;;  %v2589_v22 = vmul.f32 -1.442695, %v1814_v4 }
0x117f   :  { %v1693_v23 = vpop.f32.mrb[20].mxu0 }
0x1180   :  { %v1697_v46 = vadd.f32 %v1693_v23, %v199_v63  ;;  %v2870_v61 = vpop.f32.mrb[21].mxu0  ;;  %v205_v23 = vadd.f32 %v3431_v38, %v3429_v37 }
0x1182   :  { %3214 = vtanh.f32 %v1697_v46  ;;  %v2587_v43 = vmul.f32 -1.442695, %v1697_v46 }
0x1183   :  { %3216 = vpow2.f32 %v2589_v22 }
0x1184   :  { %3218 = vpow2.f32 %v2587_v43 }
0x1188   :  { %v3213_v10 = vpop.eup %3212 }
0x1189   :  { %1828 = vrot.lane.b32.xlu1 %v3213_v10, %s3249_s3 }
0x118c   :  { %v3215_v0 = vpop.eup %3214 }
0x118d   :  { %1711 = vrot.lane.b32.xlu1 %v3215_v0, %s3249_s3  ;;  %v3217_v41 = vpop.eup %3216 }
0x118e   :  { %v1818_v60 = vadd.f32 1.0, %v3217_v41  ;;  %v3219_v1 = vpop.eup %3218 }
0x118f   :  { %v1701_v33 = vadd.f32 1.0, %v3219_v1 }
0x1190   :  { %3220 = vrcp.f32 %v1818_v60 }
0x1191   :  { %3222 = vrcp.f32 %v1701_v33 }
0x119a   :  { %v3221_v29 = vpop.eup %3220 }
0x119b   :  { %v3223_v11 = vpop.eup %3222  ;;  %v1826_v21 = vmul.f32 %v3221_v29, %v1824_v19 }
0x119c   :  { %v1709_v27 = vmul.f32 %v3223_v11, %v1707_v51 }
0x11fb   :  { %v1829_v7 = vpop.permute.xlu1 %1828 }
0x11fc   :  { %v1831_v8 = vmul.f32 %v3221_v29, %v1829_v7 }
0x11fe   :  { %1833 = vrot.lane.b32.xlu1 %v1831_v8, %s3249_s3 }
0x11ff   :  { %v1712_v12 = vpop.permute.xlu1 %1711 }
0x1200   :  { %v1714_v13 = vmul.f32 %v3223_v11, %v1712_v12 }
0x1202   :  { %1716 = vrot.lane.b32.xlu1 %v1714_v13, %s3249_s3 }
0x1270   :  { %v1834_v52 = vpop.permute.xlu1 %1833 }
0x1271   :  { %v1836_v24 = vadd.f32 %v1834_v52, %v1826_v21  ;;  %v2388_v52 = vld [vmem:[%s4045_s10] sm:$0xff] }
0x1273   :  { %3224 = vtanh.f32 %v1836_v24 }
0x1274   :  { %v1717_v62 = vpop.permute.xlu1 %1716 }
0x1275   :  { %v1719_v31 = vadd.f32 %v1717_v62, %v1709_v27 }
0x1277   :  { %3226 = vtanh.f32 %v1719_v31 }
0x127d   :  { %v3225_v53 = vpop.eup %3224 }
0x127e   :  { %1839 = vrot.lane.b32.xlu0 %v3225_v53, %s3249_s3  ;;  %v2391_v53 = vld [vmem:[%s4045_s10 + $0x18] sm:$0xff] }
0x1281   :  { %v3227_v42 = vpop.eup %3226 }
0x1282   :  { %1722 = vrot.lane.b32.xlu1 %v3227_v42, %s3249_s3 }
0x12f0   :  { %v1840_v54 = vpop.permute.xlu0 %1839 }
0x12f1   :  { %v1842_v57 = vmul.f32 %v3221_v29, %v1840_v54  ;;  %v2098_v54 = vld [vmem:[%s4046_s7] sm:$0xff] }
0x12f3   :  { %1844 = vrot.lane.b32.xlu0 %v1842_v57, %s3250_s2  ;;  %v2099_v57 = vld [vmem:[%s4046_s7 + $0x8] sm:$0xff] }
0x12f4   :  { %v1723_v47 = vpop.permute.xlu1 %1722 }
0x12f5   :  { %v1725_v48 = vmul.f32 %v3223_v11, %v1723_v47  ;;  %v3070_v47 = vpack.c.bf16 %v2099_v57, %v2098_v54 }
0x12f7   :  { %1727 = vrot.lane.b32.xlu1 %v1725_v48, %s3250_s2  ;;  %1851 = vrot.lane.b32.xlu0 %v1836_v24, %s3251_s30  ;;  %v2389_v24 = vld [vmem:[%s4045_s10 + $0x8] sm:$0xff]  ;;  %v2100_v48 = vld [vmem:[%s4046_s7 + $0x10] sm:$0xff] }
0x12f8   :  { %v3087_v51 = vpack.c.bf16 %v2389_v24, %v2388_v52  ;;  %3071 = vmatprep.subr.bf16.mxu0 %v3070_v47 }
0x12fb   :  { %1734 = vrot.lane.b32.xlu0 %v1719_v31, %s3251_s30  ;;  %v2390_v31 = vld [vmem:[%s4045_s10 + $0x10] sm:$0xff] }
0x12fc   :  { %v3090_v42 = vpack.c.bf16 %v2391_v53, %v2390_v31 }
0x1365   :  { %v1845_v6 = vpop.permute.xlu0 %1844 }
0x1366   :  { %v1847_v40 = vmul.f32 %v1845_v6, %v3546_v34  ;;  %v2101_v6 = vld [vmem:[%s4046_s7 + $0x18] sm:$0xff] }
0x1368   :  { %v3878_v56 = vadd.f32 %v1848_v55, %v1847_v40  ;;  %1857 = vst.msk [vmem:[#allocation3 + $0x8] sm:$0xff] %vm71_vm0, %v1847_v40  ;;  %v3074_v55 = vpack.c.bf16 %v2101_v6, %v2100_v48 }
0x1369   :  { %v1728_v58 = vpop.permute.xlu1 %1727  ;;  %v1852_v30 = vpop.permute.xlu0 %1851 }
0x136a   :  { %v1730_v50 = vmul.f32 %v1728_v58, %v3541_v32  ;;  %v1854_v9 = vmul.f32 %v1852_v30, %v3546_v34  ;;  %2902 = vmatmul.mubr.msk.f32.vlgmr.msra.gmra.mrb[22].mxu1 %vm71_vm0, %v3878_v56  ;;  %v2086_v30 = vld [vmem:[%s4047_s6] sm:$0xff] }
0x136b   :  { %2952 = vmatprep.mubr.msk.f32.mxu1 %vm3248_vm1, %v3246_v3  ;;  %3088 = vmatpush3.bf16.msra.mxu1 %v3087_v51 }
0x136c   :  { %v3891_v44 = vadd.f32 %v1731_v35, %v1730_v50  ;;  %1740 = vst.msk [vmem:[#allocation2 + $0x30] sm:$0xff] %vm71_vm0, %v1730_v50  ;;  %v1856_v2 = vadd.f32 %v1855_v5, %v1854_v9  ;;  %3089 = vmatprep.subr.bf16.mxu1 %v3247_v18  ;;  %v2087_v35 = vld [vmem:[%s4047_s6 + $0x8] sm:$0xff] }
0x136d   :  { %v1735_v16 = vpop.permute.xlu0 %1734  ;;  %v3078_v50 = vpack.c.bf16 %v2087_v35, %v2086_v30 }
0x136e   :  { %v1737_v4 = vmul.f32 %v1735_v16, %v3541_v32  ;;  %2891 = vmatmul.mubr.msk.f32.vlgmr.msra.gmra.mrb[22].mxu0 %vm71_vm0, %v3891_v44  ;;  %2050 = vrot.lane.b32.xlu0 %v1856_v2, %s3249_s3  ;;  %v2384_v2 = vld [vmem:[%s4048_s9] sm:$0xff]  ;;  %v2385_v16 = vld [vmem:[%s4048_s9 + $0x8] sm:$0xff] }
0x136f   :  { %3091 = vmatpush3.bf16.msra.mxu1 %v3090_v42  ;;  %3073 = vmatpush3.bf16.msra.mxu0 %v3070_v47 }
0x1370   :  { %v1739_v34 = vadd.f32 %v1738_v26, %v1737_v4  ;;  %3092 = vmatprep.subr.bf16.mxu1 %v3247_v18  ;;  %3075 = vmatprep.subr.bf16.mxu0 %v3074_v55  ;;  %v2075_v4 = vmul.f32 %v3878_v56, %v225_v15  ;;  %v3245_v15 = vld [vmem:[%s4044_s1 + $0x38] sm:$0xff] }
0x1372   :  { %1940 = vrot.lane.b32.xlu0 %v1739_v34, %s3249_s3  ;;  %v3244_v34 = vld [vmem:[%s4044_s1] sm:$0xff] }
0x1373   :  { %3077 = vmatpush3.bf16.msra.mxu0 %v3074_v55 }
0x1374   :  { %3079 = vmatprep.subr.bf16.mxu0 %v3078_v50 }
0x13e0   :  { %v2051_v29 = vpop.permute.xlu0 %2050 }
0x13e4   :  { %v1941_v12 = vpop.permute.xlu0 %1940 }
0x143d   :  { %v2037_v59 = vpop.f32.mrb[22].mxu1 }
0x143e   :  { %v2041_v28 = vadd.f32 %v2037_v59, %v165_v49  ;;  %v2903_v63 = vpop.f32.mrb[23].mxu1  ;;  %v3093_v59 = vpack.c.bf16 %v2385_v16, %v2384_v2 }
0x143f   :  { %v2386_v63 = vld [vmem:[%s4048_s9 + $0x10] sm:$0xff] }
0x1440   :  { %3228 = vtanh.f32 %v2041_v28  ;;  %v2593_v10 = vmul.f32 -1.442695, %v2041_v28 }
0x1441   :  { %v1927_v39 = vpop.f32.mrb[22].mxu0 }
0x1442   :  { %v1931_v32 = vadd.f32 %v1927_v39, %v205_v23  ;;  %v2892_v25 = vpop.f32.mrb[23].mxu0  ;;  %v2387_v23 = vld [vmem:[%s4048_s9 + $0x18] sm:$0xff] }
0x1443   :  { %v3096_v39 = vpack.c.bf16 %v2387_v23, %v2386_v63  ;;  %v2089_v25 = vld [vmem:[%s4047_s6 + $0x18] sm:$0xff] }
0x1444   :  { %3230 = vtanh.f32 %v1931_v32  ;;  %v2591_v36 = vmul.f32 -1.442695, %v1931_v32  ;;  %v2088_v32 = vld [vmem:[%s4047_s6 + $0x10] sm:$0xff] }
0x1445   :  { %3232 = vpow2.f32 %v2593_v10  ;;  %v3082_v10 = vpack.c.bf16 %v2089_v25, %v2088_v32 }
0x1446   :  { %3234 = vpow2.f32 %v2591_v36  ;;  %v2091_v36 = vld [vmem:[#allocation3 + $0x8] sm:$0xff] }
0x144a   :  { %v3229_v46 = vpop.eup %3228 }
0x144b   :  { %2055 = vrot.lane.b32.xlu1 %v3229_v46, %s3249_s3  ;;  %v1965_v46 = vmul.f32 %v3891_v44, %v232_v20  ;;  %v2095_v20 = vld [vmem:[#allocation3 + $0x28] sm:$0xff]  ;;  %v2096_v44 = vld [vmem:[#allocation3 + $0x30] sm:$0xff] }
0x144e   :  { %v3231_v61 = vpop.eup %3230 }
0x144f   :  { %1945 = vrot.lane.b32.xlu1 %v3231_v61, %s3249_s3  ;;  %v3233_v45 = vpop.eup %3232 }
0x1450   :  { %v2045_v0 = vadd.f32 1.0, %v3233_v45  ;;  %v3235_v22 = vpop.eup %3234  ;;  %v2093_v45 = vld [vmem:[#allocation3 + $0x18] sm:$0xff] }
0x1451   :  { %v1935_v37 = vadd.f32 1.0, %v3235_v22  ;;  %v2078_v22 = vld [vmem:[#allocation2] sm:$0xff] }
0x1452   :  { %3236 = vrcp.f32 %v2045_v0  ;;  %v2097_v0 = vld [vmem:[#allocation3 + $0x38] sm:$0xff] }
0x1453   :  { %3238 = vrcp.f32 %v1935_v37  ;;  %v2079_v37 = vld [vmem:[#allocation2 + $0x8] sm:$0xff] }
0x145c   :  { %v3237_v38 = vpop.eup %3236 }
0x145d   :  { %v3239_v60 = vpop.eup %3238  ;;  %v2053_v7 = vmul.f32 %v3237_v38, %v2051_v29 }
0x145e   :  { %v1943_v13 = vmul.f32 %v3239_v60, %v1941_v12 }
0x14bd   :  { %v2056_v43 = vpop.permute.xlu1 %2055 }
0x14be   :  { %v2058_v41 = vmul.f32 %v3237_v38, %v2056_v43  ;;  %v2081_v43 = vld [vmem:[#allocation2 + $0x18] sm:$0xff] }
0x14c0   :  { %2060 = vrot.lane.b32.xlu1 %v2058_v41, %s3249_s3  ;;  %v2082_v41 = vld [vmem:[#allocation2 + $0x20] sm:$0xff] }
0x14c1   :  { %v1946_v1 = vpop.permute.xlu1 %1945 }
0x14c2   :  { %v1948_v33 = vmul.f32 %v3239_v60, %v1946_v1  ;;  %v2084_v1 = vld [vmem:[#allocation2 + $0x30] sm:$0xff] }
0x14c4   :  { %1950 = vrot.lane.b32.xlu1 %v1948_v33, %s3249_s3 }
0x1532   :  { %v2061_v8 = vpop.permute.xlu1 %2060 }
0x1533   :  { %v2063_v11 = vadd.f32 %v2061_v8, %v2053_v7 }
0x1535   :  { %3240 = vtanh.f32 %v2063_v11  ;;  %v2613_v11 = vld [vmem:[%s4049_s11] ss:$0 sm:$0xff] }
0x1536   :  { %v1951_v19 = vpop.permute.xlu1 %1950 }
0x1537   :  { %v1953_v21 = vadd.f32 %v1951_v19, %v1943_v13 }
0x1539   :  { %3242 = vtanh.f32 %v1953_v21  ;;  %v2610_v21 = vld [vmem:[%s4051_s8] ss:$0 sm:$0xff] }
0x153f   :  { %v3241_v27 = vpop.eup %3240 }
0x1540   :  { %2066 = vrot.lane.b32.xlu0 %v3241_v27, %s3249_s3 }
0x1543   :  { %v3243_v62 = vpop.eup %3242 }
0x1544   :  { %1956 = vrot.lane.b32.xlu1 %v3243_v62, %s3249_s3 }
0x15b2   :  { %v2067_v40 = vpop.permute.xlu0 %2066 }
0x15b3   :  { %v2069_v58 = vmul.f32 %v3237_v38, %v2067_v40  ;;  %v2080_v38 = vld [vmem:[#allocation2 + $0x10] sm:$0xff] }
0x15b5   :  { %2071 = vrot.lane.b32.xlu0 %v2069_v58, %s3250_s2 }
0x15b6   :  { %v1957_v5 = vpop.permute.xlu1 %1956 }
0x15b7   :  { %v1959_v9 = vmul.f32 %v3239_v60, %v1957_v5  ;;  %v2083_v60 = vld [vmem:[#allocation2 + $0x28] sm:$0xff] }
0x15b9   :  { %1961 = vrot.lane.b32.xlu1 %v1959_v9, %s3250_s2 }
0x1627   :  { %v2072_v26 = vpop.permute.xlu0 %2071 }
0x1628   :  { %v2074_v49 = vmul.f32 %v3244_v34, %v2072_v26 }
0x162a   :  { %v2076_v28 = vadd.f32 %v2075_v4, %v2074_v49  ;;  %2077 = vst.msk [vmem:[#allocation3] sm:$0xff] %vm71_vm0, %v2074_v49 }
0x162b   :  { %v1962_v14 = vpop.permute.xlu1 %1961 }
0x162c   :  { %v1964_v56 = vmul.f32 %v3245_v15, %v1962_v14  ;;  %2953 = vmatmul.mubr.msk.f32.vlgmr.msra.gmra.mrb[24].mxu1 %vm71_vm0, %v2076_v28 }
0x162d   :  { %3094 = vmatpush3.bf16.msra.mxu1 %v3093_v59  ;;  %2963 = vmatprep.mubr.msk.f32.mxu1 %vm3248_vm1, %v3246_v3 }
0x162e   :  { %1967 = vst.msk [vmem:[#allocation2 + $0x38] sm:$0xff] %vm71_vm0, %v1964_v56  ;;  %3095 = vmatprep.subr.bf16.mxu1 %v3247_v18  ;;  %v1966_v3 = vadd.f32 %v1965_v46, %v1964_v56  ;;  %v2092_v18 = vld [vmem:[#allocation3 + $0x10] sm:$0xff] }
0x1631   :  { %3097 = vmatpush3.bf16.msra.mxu1 %v3096_v39  ;;  %v2090_v61 = vld [vmem:[#allocation3] sm:$0xff] }
0x1632   :  { %2912 = vmatprep.mubr.msk.f32.mxu0 %vm71_vm0, %v2090_v61 }
0x1633   :  { %2913 = vmatmul.mubr.msk.f32.vlgmr.msra.gmra.mrb[24].mxu0 %vm71_vm0, %v2091_v36 }
0x1634   :  { %3081 = vmatpush3.bf16.msra.mxu0 %v3078_v50  ;;  %2964 = vmatmul.mubr.msk.f32.vlgmr.msra.gmra.mrb[26].mxu1 %vm71_vm0, %v1966_v3 }
0x1635   :  { %2915 = vmatprep.mubr.msk.f32.mxu0 %vm71_vm0, %v2092_v18  ;;  %3083 = vmatprep.subr.bf16.mxu0 %v3082_v10  ;;  %v2085_v33 = vld [vmem:[#allocation2 + $0x38] sm:$0xff] }
0x1637   :  { %2916 = vmatmul.mubr.msk.f32.gmra.mrb[26].mxu0 %vm71_vm0, %v2093_v45 }
0x1638   :  { %2918 = vmatprep.mubr.msk.f32.mxu0 %vm71_vm0, %v2094_v17  ;;  %3085 = vmatpush3.bf16.msra.mxu0 %v3082_v10 }
0x163b   :  { %2919 = vmatmul.mubr.msk.f32.gmra.mrb[28].mxu0 %vm71_vm0, %v2095_v20 }
0x163c   :  { %2921 = vmatprep.mubr.msk.f32.mxu0 %vm71_vm0, %v2096_v44 }
0x163f   :  { %2922 = vmatmul.mubr.msk.f32.gmra.mrb[30].mxu0 %vm71_vm0, %v2097_v0 }
0x1640   :  { %2932 = vmatprep.mubr.msk.f32.mxu0 %vm71_vm0, %v2078_v22 }
0x1643   :  { %2933 = vmatmul.mubr.msk.f32.vlgmr.msra.gmra.mrb[24].mxu0 %vm71_vm0, %v2079_v37 }
0x1644   :  { %2935 = vmatprep.mubr.msk.f32.mxu0 %vm71_vm0, %v2080_v38 }
0x1647   :  { %2936 = vmatmul.mubr.msk.f32.gmra.mrb[26].mxu0 %vm71_vm0, %v2081_v43 }
0x1648   :  { %2938 = vmatprep.mubr.msk.f32.mxu0 %vm71_vm0, %v2082_v41 }
0x164b   :  { %2939 = vmatmul.mubr.msk.f32.gmra.mrb[28].mxu0 %vm71_vm0, %v2083_v60 }
0x164c   :  { %2941 = vmatprep.mubr.msk.f32.mxu0 %vm71_vm0, %v2084_v1 }
0x164f   :  { %2942 = vmatmul.mubr.msk.f32.gmra.mrb[30].mxu0 %vm71_vm0, %v2085_v33 }
0x16ff   :  { %v2461_v29 = vpop.f32.mrb[24].mxu1 }
0x1700   :  { %v2954_v7 = vpop.f32.mrb[25].mxu1 }
0x1707   :  { %v2534_v8 = vpop.f32.mrb[26].mxu1 }
0x1708   :  { %v2535_v12 = vadd.f32 %v2534_v8, %v2461_v29  ;;  %v2965_v13 = vpop.f32.mrb[27].mxu1 }
0x170a   :  { %v2545_v19 = vadd.f32 %v2613_v11, %v2535_v12 }
0x170c   :  { %2547 = vst.msk [vmem:[%s4050_s13] sm:$0xff] %vm2546_vm2, %v2545_v19 }
0x1716   :  { %v2934_v52 = vpop.f32.mrb[24].mxu0 }
0x1717   :  { %v2368_v24 = vadd.f32 %v2934_v52, %v2610_v21  ;;  %v2321_v51 = vpop.f32.mrb[25].mxu0 }
0x1718   :  { %v2367_v27 = vadd.f32 %v2610_v21, %v2321_v51 }
0x1719   :  { %2377 = vst.msk [vmem:[%s4052_s12 + $0x8] sm:$0xff] %vm2375_vm3, %v2368_v24 }
0x171a   :  { %2376 = vst.msk [vmem:[%s4052_s12] sm:$0xff] %vm2375_vm3, %v2367_v27  ;;  %v2937_v62 = vpop.f32.mrb[26].mxu0 }
0x171b   :  { %v2370_v31 = vadd.f32 %v2937_v62, %v2610_v21  ;;  %v2331_v53 = vpop.f32.mrb[27].mxu0 }
0x171c   :  { %v2369_v42 = vadd.f32 %v2610_v21, %v2331_v53 }
0x171d   :  { %2379 = vst.msk [vmem:[%s4052_s12 + $0x18] sm:$0xff] %vm2375_vm3, %v2370_v31 }
0x171e   :  { %2378 = vst.msk [vmem:[%s4052_s12 + $0x10] sm:$0xff] %vm2375_vm3, %v2369_v42  ;;  %v2940_v54 = vpop.f32.mrb[28].mxu0 }
0x171f   :  { %v2372_v57 = vadd.f32 %v2940_v54, %v2610_v21  ;;  %v2341_v47 = vpop.f32.mrb[29].mxu0 }
0x1720   :  { %v2371_v48 = vadd.f32 %v2610_v21, %v2341_v47 }
0x1721   :  { %2381 = vst.msk [vmem:[%s4052_s12 + $0x28] sm:$0xff] %vm2375_vm3, %v2372_v57 }
0x1722   :  { %2380 = vst.msk [vmem:[%s4052_s12 + $0x20] sm:$0xff] %vm2375_vm3, %v2371_v48  ;;  %v2943_v6 = vpop.f32.mrb[30].mxu0 }
0x1723   :  { %v2374_v55 = vadd.f32 %v2943_v6, %v2610_v21  ;;  %v2351_v40 = vpop.f32.mrb[31].mxu0 }
0x1724   :  { %v2373_v58 = vadd.f32 %v2610_v21, %v2351_v40 }
0x1725   :  { %2383 = vst.msk [vmem:[%s4052_s12 + $0x38] sm:$0xff] %vm2375_vm3, %v2374_v55 }
0x1726   :  { %2382 = vst.msk [vmem:[%s4052_s12 + $0x30] sm:$0xff] %vm2375_vm3, %v2373_v58 }

</bundles_post_ra>
